<compile_context>
chip_gen: v6e
topology: v6e:2x2x1
jax: 0.10.0
libtpu: 0.0.40
codegen_flags: <defaults>
</compile_context>

<pallas_src>
import functools

import jax
import jax.numpy as jnp
from jax import lax
from jax.experimental import pallas as pl
from jax.experimental.pallas import tpu as pltpu


def _vq_kernel(z_ref, e_ref, et_ref, esqh_ref, zq_ref, idx_ref, sq_ref):
    """One (spatial tile t, batch b) step; all outputs are whole-block writes."""
    z = z_ref[0]                       # (C, TN)  f32
    e = e_ref[...]                     # (n_e, C) bf16  (pre-cast in wrapper)
    et = et_ref[...]                   # (C, n_e) f32   (exact gather operand)
    esqh = esqh_ref[...]               # (n_e, 1) f32 = 0.5 * ||e||^2
    n_e = e.shape[0]

    # Distance proxy: 0.5*||e||^2 - e.z  (argmin-equivalent to full distance;
    # per-column ||z||^2 dropped, 2x scale folded into esqh in the wrapper).
    d = esqh - jnp.dot(e, z.astype(jnp.bfloat16),
                       preferred_element_type=jnp.float32)      # (n_e, TN) f32

    # First-occurrence argmin over the codebook (sublane) axis, torch-style.
    d_min = jnp.min(d, axis=0, keepdims=True)                   # (1, TN)
    iota_col = lax.broadcasted_iota(jnp.int32, (n_e, 1), 0)     # (n_e, 1)
    idx = jnp.min(jnp.where(d == d_min, iota_col, n_e),
                  axis=0, keepdims=True)                        # (1, TN)
    idx_ref[0] = idx                                            # lane-dense

    # Embedding lookup as an exact one-hot matmul: (C, n_e) @ (n_e, TN).
    # Kept in f32 so z_q carries the exact f32 codebook rows (matches torch).
    onehot = (iota_col == idx).astype(jnp.float32)              # (n_e, TN)
    zq = jnp.dot(et, onehot, preferred_element_type=jnp.float32)
    zq_ref[0] = zq.astype(zq_ref.dtype)

    # Commitment-loss partials: sublane reduce only; the lane reduce (and the
    # padded-tail mask) happen once in the wrapper.
    diff = zq - z
    sq_ref[0] = jnp.sum(diff * diff, axis=0, keepdims=True)     # (1, TN)


@functools.partial(jax.jit, static_argnames=("beta", "tile_s"))
def vector_quantizer_forward(z_nchw, embedding, *, beta, tile_s=2048):
    """Forward pass of VectorQuantizer (legacy=True, remap=None,
    sane_index_shape=False).

    Args:
      z_nchw:    (B, C, H, W) float32, C == e_dim.
      embedding: (n_e, e_dim) float32 codebook.
      beta:      commitment cost.
      tile_s:    max spatial lanes per kernel tile (multiple of 128).
    Returns:
      (z_q, loss, (None, None, min_encoding_indices))
        z_q:  (B, C, H, W) float32
        loss: scalar float32
        min_encoding_indices: (B*H*W,) int32
          # TODO(synk): torch returns int64 indices; int32 kept here (n_e fits).
    """
    B, C, H, W = z_nchw.shape
    n_e, e_dim = embedding.shape
    assert C == e_dim, "channel dim must equal e_dim"
    S = H * W

    # b c h w -> b c (h w): pure reshape, no transpose / extra HBM pass.
    z_bcs = z_nchw.reshape(B, C, S).astype(jnp.float32)

    # One-time codebook invariants (tiny: n_e x e_dim), hoisted out of the grid.
    emb = embedding.astype(jnp.float32)
    emb_bf = emb.astype(jnp.bfloat16)                    # distance-matmul operand
    emb_t = emb.T                                        # (e_dim, n_e) f32
    emb_sq_half = 0.5 * jnp.sum(emb * emb, axis=1, keepdims=True)   # (n_e, 1)

    # Spatial tiling (lane axis); pad the ragged tail if necessary.
    if S <= tile_s:
        tn, s_pad = S, S
    else:
        tn = tile_s
        s_pad = -(-S // tn) * tn
    num_t = s_pad // tn
    padded = s_pad != S
    if padded:
        z_bcs = jnp.pad(z_bcs, ((0, 0), (0, 0), (0, s_pad - S)))

    # Explicit VMEM budget: double-buffered blocks + codebook + the (n_e, TN)
    # intermediates, with headroom; capped so it stays safe on v7x (64 MiB).
    # TODO(synk): for very large codebooks (n_e >= 4K) add an n_e-tiling grid
    # axis with an online running-min/argmin carry instead of whole-codebook
    # residency.
    vmem_est = (2 * (2 * C * tn * 4)          # z + z_q blocks, double-buffered
                + 2 * (2 * tn * 4)            # idx + sq blocks, double-buffered
                + 2 * (n_e * C * 6 + n_e * 4)  # e(bf16) + e^T(f32) + 0.5||e||^2
                + 6 * n_e * tn * 4            # d / compares / one-hot
                + (4 << 20))
    vmem_limit = int(min(max(vmem_est, 32 << 20), 48 << 20))

    zq_bcs, idx_b1s, sq_b1s = pl.pallas_call(
        _vq_kernel,
        out_shape=(
            jax.ShapeDtypeStruct((B, C, s_pad), jnp.float32),
            jax.ShapeDtypeStruct((B, 1, s_pad), jnp.int32),
            jax.ShapeDtypeStruct((B, 1, s_pad), jnp.float32),
        ),
        grid_spec=pltpu.PrefetchScalarGridSpec(
            num_scalar_prefetch=0,
            grid=(num_t, B),
            in_specs=[
                pl.BlockSpec((1, C, tn), lambda t, b: (b, 0, t)),   # z
                pl.BlockSpec((n_e, e_dim), lambda t, b: (0, 0)),    # e (bf16)
                pl.BlockSpec((e_dim, n_e), lambda t, b: (0, 0)),    # e^T (f32)
                pl.BlockSpec((n_e, 1), lambda t, b: (0, 0)),        # 0.5||e||^2
            ],
            out_specs=[
                pl.BlockSpec((1, C, tn), lambda t, b: (b, 0, t)),   # z_q
                pl.BlockSpec((1, 1, tn), lambda t, b: (b, 0, t)),   # indices
                pl.BlockSpec((1, 1, tn), lambda t, b: (b, 0, t)),   # sq partials
            ],
        ),
        # Every grid step writes disjoint blocks and there is no carried state,
        # so both axes can be sharded across TensorCores (v7x megacore).
        compiler_params=pltpu.CompilerParams(
            dimension_semantics=("parallel", "parallel"),
            vmem_limit_bytes=vmem_limit),
    )(z_bcs, emb_bf, emb_t, emb_sq_half)

    # Padded spatial columns carry arbitrary idx / z_q / sq values; they are
    # dropped here before any use (this slice IS the padding mask).
    sq_sum = jnp.sum(sq_b1s[:, 0, :S])
    mse = sq_sum / jnp.float32(B * S * e_dim)
    # legacy: mean((zq.detach()-z)^2) + beta*mean((zq-z.detach())^2) == (1+beta)*mse
    loss = (1.0 + jnp.float32(beta)) * mse

    z_q = zq_bcs[:, :, :S].reshape(B, C, H, W)        # pure reshape back to NCHW
    min_encoding_indices = idx_b1s[:, 0, :S].reshape(-1)   # (b, h, w) order

    perplexity = None
    min_encodings = None
    return z_q, loss, (perplexity, min_encodings, min_encoding_indices)


def _check(z, embedding, beta, tile_s):
    """Robust correctness check (tolerant to exact near-tie argmin flips)."""
    z_q, loss, (_, _, idx) = vector_quantizer_forward(
        z, embedding, beta=beta, tile_s=tile_s)
    jax.block_until_ready((z_q, loss, idx))

    B, C, H, W = z.shape
    assert z_q.shape == z.shape
    assert idx.shape == (B * H * W,)

    zf = jnp.transpose(z, (0, 2, 3, 1)).reshape(-1, C)
    zq_flat = jnp.transpose(z_q, (0, 2, 3, 1)).reshape(-1, C)

    # 1) Self-consistency: z_q rows are exactly the gathered codebook rows.
    gathered = embedding[idx]
    assert bool(jnp.allclose(zq_flat, gathered, atol=1e-6, rtol=1e-6))

    # 2) Optimality: the chosen code is (within bf16 tolerance) the closest one.
    d = (jnp.sum(zf ** 2, axis=1, keepdims=True)
         + jnp.sum(embedding ** 2, axis=1)[None, :]
         - 2.0 * zf @ embedding.T)
    d_sel = jnp.take_along_axis(d, idx[:, None], axis=1)[:, 0]
    d_best = jnp.min(d, axis=1)
    assert bool(jnp.all(d_sel <= d_best + 1e-2))

    # 3) Loss matches (1+beta)*mse of the kernel's own assignment and the
    #    pure-JAX reference loss (near-tie flips move it negligibly).
    mse_k = jnp.mean((gathered - zf) ** 2)
    assert bool(jnp.allclose(loss, (1.0 + beta) * mse_k, atol=1e-6, rtol=1e-4))
    idx_ref = jnp.argmin(d, axis=1)
    mse_ref = jnp.mean((embedding[idx_ref] - zf) ** 2)
    assert bool(jnp.allclose(loss, (1.0 + beta) * mse_ref, atol=1e-5, rtol=1e-3))


if __name__ == "__main__":
    # Small synthetic config consistent with the module.
    n_e = 256        # codebook size
    e_dim = 16       # embedding / channel dim
    beta = 0.25

    key = jax.random.PRNGKey(0)
    k_e, k_z1, k_z2 = jax.random.split(key, 3)

    # Deterministic parameter init: uniform(-1/n_e, 1/n_e), as in __init__.
    embedding = jax.random.uniform(
        k_e, (n_e, e_dim), dtype=jnp.float32,
        minval=-1.0 / n_e, maxval=1.0 / n_e)

    # Main config: B=2, C=16, 16x16 spatial -> single 256-lane tile per batch.
    z1 = jax.random.normal(k_z1, (2, e_dim, 16, 16), dtype=jnp.float32)
    _check(z1, embedding, beta, tile_s=2048)

    # Multi-tile + ragged tail: 40x40 spatial (S=1600), 256-lane tiles, padded.
    z2 = jax.random.normal(k_z2, (2, e_dim, 40, 40), dtype=jnp.float32)
    _check(z2, embedding, beta, tile_s=256)

    print("KERNEL_OK")
</pallas_src>

<mosaic_0001>
module attributes {stable_mosaic.version = 11 : i64} {
  func.func @_vq_kernel(%arg0: i32, %arg1: i32, %arg2: memref<1x16x256xf32, #tpu.memory_space<vmem>>, %arg3: memref<256x16xbf16, #tpu.memory_space<vmem>>, %arg4: memref<16x256xf32, #tpu.memory_space<vmem>>, %arg5: memref<256x1xf32, #tpu.memory_space<vmem>>, %arg6: memref<1x16x256xf32, #tpu.memory_space<vmem>>, %arg7: memref<1x1x256xi32, #tpu.memory_space<vmem>>, %arg8: memref<1x1x256xf32, #tpu.memory_space<vmem>>) attributes {dimension_semantics = [#tpu.dimension_semantics<parallel>, #tpu.dimension_semantics<parallel>], iteration_bounds = array<i64: 1, 2>, scalar_prefetch = 0 : i64, scratch_operands = 0 : i64, tpu.core_type = #tpu.core_type<tc>, window_params = [{transform_indices = @transform_0, window_bounds = array<i64: 1, 16, 256>}, {pipeline_mode = #tpu.pipeline_mode<synchronous>, transform_indices = @transform_1, window_bounds = array<i64: 256, 16>}, {pipeline_mode = #tpu.pipeline_mode<synchronous>, transform_indices = @transform_2, window_bounds = array<i64: 16, 256>}, {pipeline_mode = #tpu.pipeline_mode<synchronous>, transform_indices = @transform_3, window_bounds = array<i64: 256, 1>}, {transform_indices = @transform_4, window_bounds = array<i64: 1, 16, 256>}, {transform_indices = @transform_5, window_bounds = array<i64: 1, 1, 256>}, {transform_indices = @transform_6, window_bounds = array<i64: 1, 1, 256>}]} {
    %c0 = arith.constant 0 : index
    %c0_0 = arith.constant 0 : index
    %c0_1 = arith.constant 0 : index
    %0 = vector.load %arg2[%c0, %c0_0, %c0_1] : memref<1x16x256xf32, #tpu.memory_space<vmem>>, vector<1x16x256xf32>
    %1 = vector.shape_cast %0 : vector<1x16x256xf32> to vector<16x256xf32>
    %c0_2 = arith.constant 0 : index
    %c0_3 = arith.constant 0 : index
    %2 = vector.load %arg3[%c0_2, %c0_3] : memref<256x16xbf16, #tpu.memory_space<vmem>>, vector<256x16xbf16>
    %c0_4 = arith.constant 0 : index
    %c0_5 = arith.constant 0 : index
    %3 = vector.load %arg4[%c0_4, %c0_5] : memref<16x256xf32, #tpu.memory_space<vmem>>, vector<16x256xf32>
    %c0_6 = arith.constant 0 : index
    %c0_7 = arith.constant 0 : index
    %4 = vector.load %arg5[%c0_6, %c0_7] : memref<256x1xf32, #tpu.memory_space<vmem>>, vector<256x1xf32>
    %5 = arith.truncf %1 : vector<16x256xf32> to vector<16x256xbf16>
    %cst = arith.constant dense<0.000000e+00> : vector<256x256xf32>
    %6 = tpu.matmul %2, %5, %cst {dimension_numbers = #tpu.dot_dimension_numbers<[1], [0], [0], [1], [0, 0, 1, 1], [], []>} : vector<256x16xbf16>, vector<16x256xbf16>, vector<256x256xf32> -> vector<256x256xf32>
    %7 = vector.broadcast %4 : vector<256x1xf32> to vector<256x256xf32>
    %8 = arith.subf %7, %6 : vector<256x256xf32>
    %cst_8 = arith.constant dense<0x7F800000> : vector<256xf32>
    %9 = vector.multi_reduction <minimumf>, %8, %cst_8 [0] : vector<256x256xf32> to vector<256xf32>
    %10 = vector.shape_cast %9 : vector<256xf32> to vector<1x256xf32>
    %11 = tpu.iota {dimensions = array<i32: 0>} : vector<256x1xi32>
    %12 = vector.broadcast %10 : vector<1x256xf32> to vector<256x256xf32>
    %13 = arith.cmpf oeq, %8, %12 : vector<256x256xf32>
    %c256_i32 = arith.constant 256 : i32
    %14 = vector.shape_cast %11 : vector<256x1xi32> to vector<256x1xi32>
    %15 = vector.broadcast %14 : vector<256x1xi32> to vector<256x256xi32>
    %16 = vector.broadcast %c256_i32 : i32 to vector<256x256xi32>
    %17 = arith.select %13, %15, %16 : vector<256x256xi1>, vector<256x256xi32>
    %cst_9 = arith.constant dense<2147483647> : vector<256xi32>
    %18 = vector.multi_reduction <minsi>, %17, %cst_9 [0] : vector<256x256xi32> to vector<256xi32>
    %19 = vector.shape_cast %18 : vector<256xi32> to vector<1x256xi32>
    %c0_10 = arith.constant 0 : index
    %c0_11 = arith.constant 0 : index
    %c0_12 = arith.constant 0 : index
    %20 = vector.load %arg7[%c0_10, %c0_11, %c0_12] : memref<1x1x256xi32, #tpu.memory_space<vmem>>, vector<1x1x256xi32>
    %21 = vector.shape_cast %20 : vector<1x1x256xi32> to vector<1x256xi32>
    %22 = vector.shape_cast %19 : vector<1x256xi32> to vector<1x1x256xi32>
    tpu.vector_store %arg7[%c0_10, %c0_11, %c0_12], %22 {strides = array<i32>} : memref<1x1x256xi32, #tpu.memory_space<vmem>>, vector<1x1x256xi32>,
    %23 = vector.broadcast %11 : vector<256x1xi32> to vector<256x256xi32>
    %24 = vector.broadcast %19 : vector<1x256xi32> to vector<256x256xi32>
    %25 = arith.cmpi eq, %23, %24 : vector<256x256xi32>
    %26 = arith.extui %25 : vector<256x256xi1> to vector<256x256xi32>
    %27 = arith.sitofp %26 : vector<256x256xi32> to vector<256x256xf32>
    %cst_13 = arith.constant dense<0.000000e+00> : vector<16x256xf32>
    %28 = tpu.matmul %3, %27, %cst_13 {dimension_numbers = #tpu.dot_dimension_numbers<[1], [0], [0], [1], [0, 0, 1, 1], [], []>} : vector<16x256xf32>, vector<256x256xf32>, vector<16x256xf32> -> vector<16x256xf32>
    %c0_14 = arith.constant 0 : index
    %c0_15 = arith.constant 0 : index
    %c0_16 = arith.constant 0 : index
    %29 = vector.load %arg6[%c0_14, %c0_15, %c0_16] : memref<1x16x256xf32, #tpu.memory_space<vmem>>, vector<1x16x256xf32>
    %30 = vector.shape_cast %29 : vector<1x16x256xf32> to vector<16x256xf32>
    %31 = vector.shape_cast %28 : vector<16x256xf32> to vector<1x16x256xf32>
    tpu.vector_store %arg6[%c0_14, %c0_15, %c0_16], %31 {strides = array<i32>} : memref<1x16x256xf32, #tpu.memory_space<vmem>>, vector<1x16x256xf32>,
    %32 = arith.subf %28, %1 : vector<16x256xf32>
    %33 = arith.mulf %32, %32 : vector<16x256xf32>
    %cst_17 = arith.constant dense<0.000000e+00> : vector<256xf32>
    %34 = vector.multi_reduction <add>, %33, %cst_17 [0] : vector<16x256xf32> to vector<256xf32>
    %35 = vector.shape_cast %34 : vector<256xf32> to vector<1x256xf32>
    %c0_18 = arith.constant 0 : index
    %c0_19 = arith.constant 0 : index
    %c0_20 = arith.constant 0 : index
    %36 = vector.load %arg8[%c0_18, %c0_19, %c0_20] : memref<1x1x256xf32, #tpu.memory_space<vmem>>, vector<1x1x256xf32>
    %37 = vector.shape_cast %36 : vector<1x1x256xf32> to vector<1x256xf32>
    %38 = vector.shape_cast %35 : vector<1x256xf32> to vector<1x1x256xf32>
    tpu.vector_store %arg8[%c0_18, %c0_19, %c0_20], %38 {strides = array<i32>} : memref<1x1x256xf32, #tpu.memory_space<vmem>>, vector<1x1x256xf32>,
    return
  }
  func.func @transform_0(%arg0: i32, %arg1: i32) -> (i32, i32, i32) {
    %c0_i32 = arith.constant 0 : i32
    %c0_i32_0 = arith.constant 0 : i32
    return %arg1, %c0_i32, %arg0 : i32, i32, i32
  }
  func.func @transform_1(%arg0: i32, %arg1: i32) -> (i32, i32) {
    %c0_i32 = arith.constant 0 : i32
    %c0_i32_0 = arith.constant 0 : i32
    %c0_i32_1 = arith.constant 0 : i32
    return %c0_i32, %c0_i32_0 : i32, i32
  }
  func.func @transform_2(%arg0: i32, %arg1: i32) -> (i32, i32) {
    %c0_i32 = arith.constant 0 : i32
    %c0_i32_0 = arith.constant 0 : i32
    %c0_i32_1 = arith.constant 0 : i32
    return %c0_i32, %c0_i32_0 : i32, i32
  }
  func.func @transform_3(%arg0: i32, %arg1: i32) -> (i32, i32) {
    %c0_i32 = arith.constant 0 : i32
    %c0_i32_0 = arith.constant 0 : i32
    %c0_i32_1 = arith.constant 0 : i32
    return %c0_i32, %c0_i32_0 : i32, i32
  }
  func.func @transform_4(%arg0: i32, %arg1: i32) -> (i32, i32, i32) {
    %c0_i32 = arith.constant 0 : i32
    %c0_i32_0 = arith.constant 0 : i32
    return %arg1, %c0_i32, %arg0 : i32, i32, i32
  }
  func.func @transform_5(%arg0: i32, %arg1: i32) -> (i32, i32, i32) {
    %c0_i32 = arith.constant 0 : i32
    %c0_i32_0 = arith.constant 0 : i32
    return %arg1, %c0_i32, %arg0 : i32, i32, i32
  }
  func.func @transform_6(%arg0: i32, %arg1: i32) -> (i32, i32, i32) {
    %c0_i32 = arith.constant 0 : i32
    %c0_i32_0 = arith.constant 0 : i32
    return %arg1, %c0_i32, %arg0 : i32, i32, i32
  }
}

</mosaic_0001>

<bundles_post_ra>
// kernel: vector_quantizer_forward.1
= control target key start
LH: loop header
LB: loop body
LE: loop exit
PB: predicated region body
PF: predicated region fallthrough
CT: control target
= control target key end

     0   :  { %s3420_s0 = inlined_call_operand.vmem [shape: f32[2,16,256], index: 0, kind: input, shape index: {}]   ;;  %s3421_s1 = inlined_call_operand.vmem [shape: bf16[256,16], index: 1, kind: input, shape index: {}]   ;;  %s3422_s2 = inlined_call_operand.vmem [shape: f32[16,256], index: 2, kind: input, shape index: {}]   ;;  %s3423_s3 = inlined_call_operand.vmem [shape: f32[256,1], index: 3, kind: input, shape index: {}]   ;;  %s3424_s4 = inlined_call_operand.vmem [shape: f32[2,16,256], index: 4, kind: output, shape index: {0}]   ;;  %s3425_s5 = inlined_call_operand.hbm [shape: s32[2,1,256], index: 5, kind: output, shape index: {1}]   ;;  %s3426_s6 = inlined_call_operand.vmem [shape: f32[2,1,256], index: 6, kind: output, shape index: {2}]  }
   0x1   :  { %3516 = sst [smem:[#allocation48_spill]] %s3420_s0 }
   0x2   :  { %3517 = sst [smem:[#allocation49_spill]] %s3421_s1 }
   0x3   :  { %12 = vsyncpa [#allocation3], 0 }
   0x4   :  { %14 = vsyncpa [#allocation3 + $0x1], 0  ;;  %s2221_s21 = smov 0   ;;  %s2223_s22 = smov 0  }
   0x5   :  { %s2225_s23 = smov 0   ;;  %s2227_s24 = smov 0  }
   0x6   :  { %s2229_s25 = smov 0   ;;  %s2231_s26 = smov 0  }
   0x7 LB: > { %s1845_s27 = sadd.s32 4294967295, %s2180_s26   ;;  %s1846_s28 = sadd.s32 4294967294, %s2180_s26   ;;  %s2180_s26 = sphi %s2231_s26, %s20_s26   ;;  %s2176_s25 = sphi %s2229_s25, %s3636_s25   ;;  %s2172_s24 = sphi %s2227_s24, %s3635_s24   ;;  %s2168_s23 = sphi %s2225_s23, %s3634_s23   ;;  %s2164_s22 = sphi %s2223_s22, %s3633_s22   ;;  %s2160_s21 = sphi %s2221_s21, %s3632_s21  }
   0x8   : > { %s29_s29 = sadd.s32 1, %s2176_s25  ;;  %s160_s30 = sadd.s32 1, %s2168_s23 }
   0x9   : > { %p30_p0 = scmp.ge.s32.totalorder %s29_s29, 2  ;;  %p170_p1 = scmp.ne.s32.totalorder %s2168_s23, %s2164_s22 }
   0xa   : > { %p171_p2 = scmp.eq.s32.totalorder %s1845_s27, 1  ;;  %p176_p3 = scmp.ne.s32.totalorder %s2164_s22, %s2160_s21 }
   0xb   : > { %s3638_s29 = smov (%p30_p0, %s29_s29), 0  ;;  %p177_p5 = scmp.eq.s32.totalorder %s1846_s28, 1 }
   0xc   : > { %p2261_p4 = por %p171_p2, %p170_p1  ;;  %s155_s8 = ssub.s32 %s2176_s25, %s3638_s29 }
   0xd   : > { %p1849_p6 = scmp.ge.s32.totalorder %s2180_s26, 1  ;;  %p158_p7 = scmp.eq.s32.totalorder %s155_s8, 0 }
   0xe   : > { %p2268_p8 = por %p177_p5, %p176_p3  ;;  %p245_p9 = scmp.lt.s32.totalorder %s2180_s26, 3 }
   0xf   : > { %s2274_s10 = scalar_select %p158_p7, %s2168_s23, %s160_s30  }
  0x10   : > { %p246_p10 = pnand %p1849_p6, %p245_p9 }
  0x12   : > { %249 = sbr.rel (%p246_p10) target bundleno = 743 (0x2e7), region = 36 }
  0x17   : > { %p297_p11 = scmp.lt.s32.totalorder %s2172_s24, 1  ;;  %v2182_v0 = vmov 0   ;;  %s3520_s0 = sld [smem:[#allocation48_spill]]  ;;  %vm481_vm0 = vcmask 130048   ;;  %v367_v8 = vld [vmem:[%s3423_s3] sm:$0xff]  ;;  %v368_v9 = vld [vmem:[%s3423_s3 + $0x8] sm:$0xff] }
  0x18   : > { %562 = vmatprep.mubr.bf16.mxu0 %v2182_v0  ;;  %2082 = vset.pattern.permute.xlu0 %v2182_v0  ;;  %s3521_s1 = sld [smem:[#allocation49_spill]]  ;;  %v369_v10 = vld [vmem:[%s3423_s3 + $0x10] sm:$0xff]  ;;  %v370_v11 = vld [vmem:[%s3423_s3 + $0x18] sm:$0xff]  ;;  %v371_v12 = vld [vmem:[%s3423_s3 + $0x20] sm:$0xff]  ;;  %s283_s14 = sand.u32 1, %s2164_s22  }
  0x19   : > { %s2280_s11 = scalar_select %p297_p11, %s2172_s24, 1  ;;  %2083 = vset.pattern.permute.xlu1 %v2182_v0  ;;  %725 = vperm.xlu0 %2082, %v367_v8   ;;  %v372_v14 = vld [vmem:[%s3423_s3 + $0x28] sm:$0xff]  ;;  %v373_v15 = vld [vmem:[%s3423_s3 + $0x30] sm:$0xff]  ;;  %v374_v16 = vld [vmem:[%s3423_s3 + $0x38] sm:$0xff] }
  0x1a   : > { %735 = vperm.xlu1 %2083, %v369_v10   ;;  %v375_v17 = vld [vmem:[%s3423_s3 + $0x40] sm:$0xff]  ;;  %v376_v19 = vld [vmem:[%s3423_s3 + $0x48] sm:$0xff]  ;;  %v377_v20 = vld [vmem:[%s3423_s3 + $0x50] sm:$0xff]  ;;  %s3166_s16 = sshll.u32 %s283_s14, 1  ;;  %s2023_s8 = sshll.u32 %s2172_s24, 5 }
  0x1b   : > { %s3515_s12 = sshll.u32 %s2280_s11, 5  ;;  %v378_v21 = vld [vmem:[%s3423_s3 + $0x58] sm:$0xff]  ;;  %v379_v22 = vld [vmem:[%s3423_s3 + $0x60] sm:$0xff]  ;;  %v380_v24 = vld [vmem:[%s3423_s3 + $0x68] sm:$0xff]  ;;  %s285_s17 = scalar_lea.vmem [#allocation2], %s3166_s16 }
  0x1c   : > { %v381_v25 = vld [vmem:[%s3423_s3 + $0x70] sm:$0xff]  ;;  %v382_v26 = vld [vmem:[%s3423_s3 + $0x78] sm:$0xff]  ;;  %v383_v27 = vld [vmem:[%s3423_s3 + $0x80] sm:$0xff]  ;;  %s1694_s19 = scalar_lea.hbm %s3425_s5, %s2023_s8  ;;  %s1668_s20 = scalar_lea.sflag [#allocation3], %s283_s14 }
  0x1d   : > { %s2289_s15 = scalar_lea.vmem %s3520_s0, %s3515_s12  ;;  %730 = vperm.xlu0 %2082, %v368_v9   ;;  %v384_v29 = vld [vmem:[%s3423_s3 + $0x88] sm:$0xff]  ;;  %v385_v30 = vld [vmem:[%s3423_s3 + $0x90] sm:$0xff]  ;;  %v386_v31 = vld [vmem:[%s3423_s3 + $0x98] sm:$0xff]  ;;  %s1696_s12 = sshll.u32 %s285_s17, 4  ;;  %s1697_s12 = int_to_ptr.vmem [resolvable:$true] %s1696_s12 }
  0x1e   : > { %v328_v1 = vld [vmem:[%s2289_s15 + $0x8] sm:$0xff]  ;;  %v330_v2 = vld [vmem:[%s2289_s15 + $0x18] sm:$0xff]  ;;  %v327_v3 = vld [vmem:[%s2289_s15] sm:$0xff]  ;;  %740 = vperm.xlu1 %2083, %v370_v11   ;;  %s2104_s27 = scalar_lea.vmem %s1697_s12, 32  ;;  %s2185_s0 = smov [#allocation2]  }
  0x1f   : > { %v400_v4 = vpack.c.bf16 %v330_v2, %v328_v1  ;;  %v329_v5 = vld [vmem:[%s2289_s15 + $0x10] sm:$0xff]  ;;  %v2084_v7 = vld [vmem:[%s3521_s1] sm:$0xff]   ;;  %v2085_v13 = vld [vmem:[%s3521_s1 + $0x8] sm:$0xff]   ;;  %p2105_p12 = scmp.ne.s32.totalorder %s1697_s12, %s2104_s27 }
  0x20   : > { %v399_v6 = vpack.c.bf16 %v329_v5, %v327_v3  ;;  %v2086_v18 = vld [vmem:[%s3521_s1 + $0x10] sm:$0xff]   ;;  %v2087_v23 = vld [vmem:[%s3521_s1 + $0x18] sm:$0xff]   ;;  %v2088_v28 = vld [vmem:[%s3521_s1 + $0x20] sm:$0xff]  }
  0x21   : > { %544 = vmatprep.subr.bf16.mxu0 %v400_v4  ;;  %745 = vperm.xlu0 %2082, %v371_v12   ;;  %v387_v32 = vld [vmem:[%s3423_s3 + $0xa0] sm:$0xff]  ;;  %v2089_v33 = vld [vmem:[%s3521_s1 + $0x28] sm:$0xff]   ;;  %v389_v35 = vld [vmem:[%s3423_s3 + $0xb0] sm:$0xff]  ;;  %p2106_p13 = pnand %p2105_p12, %p2261_p4 }
  0x22   : > { %545 = vmatpush1.bf16.msra.mxu0 %v399_v6  ;;  %750 = vperm.xlu1 %2083, %v372_v14   ;;  %v388_v34 = vld [vmem:[%s3423_s3 + $0xa8] sm:$0xff]  ;;  %v390_v36 = vld [vmem:[%s3423_s3 + $0xb8] sm:$0xff]  ;;  %v391_v37 = vld [vmem:[%s3423_s3 + $0xc0] sm:$0xff] }
  0x23   : > { %v2090_v38 = vld [vmem:[%s3521_s1 + $0x30] sm:$0xff]   ;;  %v392_v39 = vld [vmem:[%s3423_s3 + $0xc8] sm:$0xff]  ;;  %v394_v41 = vld [vmem:[%s3423_s3 + $0xd8] sm:$0xff]  ;;  %p2107_p0 = pneg %p2106_p13 }
  0x24   : > { %v393_v40 = vld [vmem:[%s3423_s3 + $0xd0] sm:$0xff]  ;;  %v395_v42 = vld [vmem:[%s3423_s3 + $0xe0] sm:$0xff]  ;;  %v2091_v43 = vld [vmem:[%s3521_s1 + $0x38] sm:$0xff]  }
  0x25   : > { %1872 = vmatmul.mubr.msk.bf16.vlgmr.msra.gmra.mxu0 %vm481_vm0, %v2084_v7  ;;  %755 = vperm.xlu0 %2082, %v373_v15   ;;  %v396_v44 = vld [vmem:[%s3423_s3 + $0xe8] sm:$0xff]  ;;  %v397_v45 = vld [vmem:[%s3423_s3 + $0xf0] sm:$0xff]  ;;  %v398_v46 = vld [vmem:[%s3423_s3 + $0xf8] sm:$0xff] }
  0x26   : > { %572 = vmatprep.mubr.bf16.mxu0 %v2182_v0  ;;  %760 = vperm.xlu1 %2083, %v374_v16   ;;  %v2092_v47 = vld [vmem:[%s3521_s1 + $0x40] sm:$0xff]   ;;  %v2093_v48 = vld [vmem:[%s3521_s1 + $0x48] sm:$0xff]   ;;  %v2094_v49 = vld [vmem:[%s3521_s1 + $0x50] sm:$0xff]  }
  0x27   : > { %v2095_v50 = vld [vmem:[%s3521_s1 + $0x58] sm:$0xff]   ;;  %v2096_v51 = vld [vmem:[%s3521_s1 + $0x60] sm:$0xff]   ;;  %v2097_v52 = vld [vmem:[%s3521_s1 + $0x68] sm:$0xff]  }
  0x28   : > { %v2098_v53 = vld [vmem:[%s3521_s1 + $0x70] sm:$0xff]   ;;  %v2099_v54 = vld [vmem:[%s3521_s1 + $0x78] sm:$0xff]   ;;  %s2108_s1 = sshll.u32 %s2185_s0, 4  ;;  %s2109_s1 = int_to_ptr.vmem [resolvable:$false] %s2108_s1 }
  0x29   : > { %765 = vperm.xlu0 %2082, %v375_v17   ;;  %s2110_s28 = scalar_lea.vmem %s2109_s1, 64  ;;  %p2111_p1 = scmp.lt.s32.totalorder %s1697_s12, %s2109_s1 }
  0x2a   : > { %770 = vperm.xlu1 %2083, %v376_v19   ;;  %p2112_p2 = scmp.lt.s32.totalorder %s2110_s28, %s2104_s27 }
  0x2c   : > { %p2113_p3 = por %p2112_p2, %p2111_p1 }
  0x2d   : > { %1873 = vmatmul.mubr.msk.bf16.gmra.mxu0 %vm481_vm0, %v2085_v13  ;;  %775 = vperm.xlu0 %2082, %v377_v20  }
  0x2e   : > { %582 = vmatprep.mubr.bf16.mxu0 %v2182_v0  ;;  %780 = vperm.xlu1 %2083, %v378_v21   ;;  %p2114_p5 = pnand %p2113_p3, %p2107_p0 }
  0x31   : > { %785 = vperm.xlu0 %2082, %v379_v22  }
  0x32   : > { %790 = vperm.xlu1 %2083, %v380_v24  }
  0x35   : > { %1874 = vmatmul.mubr.msk.bf16.gmra.mxu0 %vm481_vm0, %v2086_v18  ;;  %795 = vperm.xlu0 %2082, %v381_v25  }
  0x36   : > { %592 = vmatprep.mubr.bf16.mxu0 %v2182_v0  ;;  %800 = vperm.xlu1 %2083, %v382_v26  }
  0x39   : > { %805 = vperm.xlu0 %2082, %v383_v27  }
  0x3a   : > { %810 = vperm.xlu1 %2083, %v384_v29  }
  0x3d   : > { %1875 = vmatmul.mubr.msk.bf16.gmra.mxu0 %vm481_vm0, %v2087_v23  ;;  %815 = vperm.xlu0 %2082, %v385_v30  }
  0x3e   : > { %602 = vmatprep.mubr.bf16.mxu0 %v2182_v0  ;;  %820 = vperm.xlu1 %2083, %v386_v31  }
  0x41   : > { %825 = vperm.xlu0 %2082, %v387_v32  }
  0x42   : > { %830 = vperm.xlu1 %2083, %v388_v34  }
  0x45   : > { %1876 = vmatmul.mubr.msk.bf16.gmra.mxu0 %vm481_vm0, %v2088_v28  ;;  %835 = vperm.xlu0 %2082, %v389_v35  }
  0x46   : > { %612 = vmatprep.mubr.bf16.mxu0 %v2182_v0  ;;  %840 = vperm.xlu1 %2083, %v390_v36  }
  0x49   : > { %845 = vperm.xlu0 %2082, %v391_v37  }
  0x4a   : > { %850 = vperm.xlu1 %2083, %v392_v39  }
  0x4d   : > { %1877 = vmatmul.mubr.msk.bf16.gmra.mxu0 %vm481_vm0, %v2089_v33  ;;  %855 = vperm.xlu0 %2082, %v393_v40  }
  0x4e   : > { %622 = vmatprep.mubr.bf16.mxu0 %v2182_v0  ;;  %860 = vperm.xlu1 %2083, %v394_v41  }
  0x51   : > { %865 = vperm.xlu0 %2082, %v395_v42  }
  0x52   : > { %870 = vperm.xlu1 %2083, %v396_v44  }
  0x55   : > { %1878 = vmatmul.mubr.msk.bf16.gmra.mxu0 %vm481_vm0, %v2090_v38  ;;  %875 = vperm.xlu0 %2082, %v397_v45  }
  0x56   : > { %632 = vmatprep.mubr.bf16.mxu0 %v2182_v0  ;;  %880 = vperm.xlu1 %2083, %v398_v46  }
  0x5d   : > { %1879 = vmatmul.mubr.msk.bf16.gmra.mxu0 %vm481_vm0, %v2091_v43 }
  0x5e   : > { %642 = vmatprep.mubr.bf16.mxu0 %v2182_v0 }
  0x65   : > { %1880 = vmatmul.mubr.msk.bf16.gmra.mxu0 %vm481_vm0, %v2092_v47 }
  0x66   : > { %652 = vmatprep.mubr.bf16.mxu0 %v2182_v0 }
  0x6d   : > { %1881 = vmatmul.mubr.msk.bf16.gmra.mxu0 %vm481_vm0, %v2093_v48 }
  0x6e   : > { %662 = vmatprep.mubr.bf16.mxu0 %v2182_v0 }
  0x75   : > { %1882 = vmatmul.mubr.msk.bf16.gmra.mxu0 %vm481_vm0, %v2094_v49 }
  0x76   : > { %672 = vmatprep.mubr.bf16.mxu0 %v2182_v0 }
  0x7d   : > { %1883 = vmatmul.mubr.msk.bf16.gmra.mxu0 %vm481_vm0, %v2095_v50 }
  0x7e   : > { %682 = vmatprep.mubr.bf16.mxu0 %v2182_v0 }
  0x85   : > { %1884 = vmatmul.mubr.msk.bf16.gmra.mxu0 %vm481_vm0, %v2096_v51 }
  0x86   : > { %692 = vmatprep.mubr.bf16.mxu0 %v2182_v0 }
  0x8d   : > { %1885 = vmatmul.mubr.msk.bf16.gmra.mxu0 %vm481_vm0, %v2097_v52 }
  0x8e   : > { %702 = vmatprep.mubr.bf16.mxu0 %v2182_v0 }
  0x94   : > { %v726_v57 = vpop.permute.xlu0 %725 }
  0x95   : > { %1886 = vmatmul.mubr.msk.bf16.gmra.mxu0 %vm481_vm0, %v2098_v53  ;;  %v736_v59 = vpop.permute.xlu1 %735 }
  0x96   : > { %712 = vmatprep.mubr.bf16.mxu0 %v2182_v0 }
  0x98   : > { %v731_v1 = vpop.permute.xlu0 %730 }
  0x99   : > { %v741_v5 = vpop.permute.xlu1 %740 }
  0x9c   : > { %v746_v14 = vpop.permute.xlu0 %745 }
  0x9d   : > { %1887 = vmatmul.mubr.msk.bf16.gmra.mxu0 %vm481_vm0, %v2099_v54  ;;  %v751_v21 = vpop.permute.xlu1 %750 }
  0xa0   : > { %v756_v28 = vpop.permute.xlu0 %755 }
  0xa1   : > { %v761_v35 = vpop.permute.xlu1 %760 }
  0xa4   : > { %v766_v42 = vpop.permute.xlu0 %765 }
  0xa5   : > { %v771_v49 = vpop.permute.xlu1 %770 }
  0xe5   : > { %v564_v55 = vpop.f32.mrf.mxu0 }
  0xe6   : > { %v2470_v62 = vsub.f32 %v726_v57, %v564_v55 }
  0xe7   : > { %v566_v56 = vpop.f32.mrf.mxu0 }
  0xe8   : > { %v2474_v0 = vsub.f32 %v726_v57, %v566_v56  ;;  %v776_v56 = vpop.permute.xlu0 %775 }
  0xe9   : > { %v568_v58 = vpop.f32.mrf.mxu0 }
  0xea   : > { %3522 = vst [vmem:[#allocation5_spill] sm:$0xff] %v2474_v0  ;;  %v2480_v7 = vsub.f32 %v731_v1, %v568_v58 }
  0xeb   : > { %v570_v60 = vpop.f32.mrf.mxu0 }
  0xec   : > { %v2486_v11 = vsub.f32 %v731_v1, %v570_v60 }
  0xed   : > { %v574_v61 = vpop.f32.mrf.mxu0 }
  0xee   : > { %v2472_v63 = vsub.f32 %v736_v59, %v574_v61  ;;  %3524 = vst [vmem:[#allocation7_spill] sm:$0xff] %v2486_v11 }
  0xef   : > { %v576_v2 = vpop.f32.mrf.mxu0 }
  0xf0   : > { %v947_v3 = vmin.f32 %v2470_v62, %v2472_v63  ;;  %v2478_v4 = vsub.f32 %v736_v59, %v576_v2 }
  0xf1   : > { %v578_v6 = vpop.f32.mrf.mxu0 }
  0xf2   : > { %3523 = vst [vmem:[#allocation6_spill] sm:$0xff] %v2478_v4  ;;  %v984_v8 = vmin.f32 %v2474_v0, %v2478_v4  ;;  %v2484_v9 = vsub.f32 %v741_v5, %v578_v6 }
  0xf3   : > { %v580_v10 = vpop.f32.mrf.mxu0 }
  0xf4   : > { %v948_v12 = vmin.f32 %v2480_v7, %v2484_v9  ;;  %v2490_v13 = vsub.f32 %v741_v5, %v580_v10 }
  0xf5   : > { %v584_v15 = vpop.f32.mrf.mxu0 }
  0xf6   : > { %3525 = vst [vmem:[#allocation8_spill] sm:$0xff] %v2490_v13  ;;  %v985_v16 = vmin.f32 %v2486_v11, %v2490_v13  ;;  %v2494_v17 = vsub.f32 %v746_v14, %v584_v15 }
  0xf7   : > { %v586_v18 = vpop.f32.mrf.mxu0 }
  0xf8   : > { %3526 = vst [vmem:[#allocation9_spill] sm:$0xff] %v2494_v17  ;;  %v949_v19 = vmin.f32 %v947_v3, %v2494_v17  ;;  %v2497_v20 = vsub.f32 %v746_v14, %v586_v18 }
  0xf9   : > { %v588_v22 = vpop.f32.mrf.mxu0 }
  0xfa   : > { %3527 = vst [vmem:[#allocation10_spill] sm:$0xff] %v2497_v20  ;;  %v986_v23 = vmin.f32 %v984_v8, %v2497_v20  ;;  %v2500_v24 = vsub.f32 %v751_v21, %v588_v22 }
  0xfb   : > { %v590_v25 = vpop.f32.mrf.mxu0 }
  0xfc   : > { %3528 = vst [vmem:[#allocation11_spill] sm:$0xff] %v2500_v24  ;;  %v950_v26 = vmin.f32 %v948_v12, %v2500_v24  ;;  %v2503_v27 = vsub.f32 %v751_v21, %v590_v25 }
  0xfd   : > { %v594_v29 = vpop.f32.mrf.mxu0 }
  0xfe   : > { %3529 = vst [vmem:[#allocation12_spill] sm:$0xff] %v2503_v27  ;;  %v987_v30 = vmin.f32 %v985_v16, %v2503_v27  ;;  %v2506_v31 = vsub.f32 %v756_v28, %v594_v29 }
  0xff   : > { %v596_v32 = vpop.f32.mrf.mxu0 }
 0x100   : > { %3530 = vst [vmem:[#allocation13_spill] sm:$0xff] %v2506_v31  ;;  %v951_v33 = vmin.f32 %v949_v19, %v2506_v31  ;;  %v2509_v34 = vsub.f32 %v756_v28, %v596_v32  ;;  %v781_v19 = vpop.permute.xlu1 %780 }
 0x101   : > { %v598_v36 = vpop.f32.mrf.mxu0 }
 0x102   : > { %3531 = vst [vmem:[#allocation14_spill] sm:$0xff] %v2509_v34  ;;  %v988_v37 = vmin.f32 %v986_v23, %v2509_v34  ;;  %v2512_v38 = vsub.f32 %v761_v35, %v598_v36  ;;  %v786_v23 = vpop.permute.xlu0 %785 }
 0x103   : > { %v600_v39 = vpop.f32.mrf.mxu0 }
 0x104   : > { %3532 = vst [vmem:[#allocation15_spill] sm:$0xff] %v2512_v38  ;;  %v952_v40 = vmin.f32 %v950_v26, %v2512_v38  ;;  %v2515_v41 = vsub.f32 %v761_v35, %v600_v39  ;;  %v791_v26 = vpop.permute.xlu1 %790 }
 0x105   : > { %v604_v43 = vpop.f32.mrf.mxu0 }
 0x106   : > { %3533 = vst [vmem:[#allocation16_spill] sm:$0xff] %v2515_v41  ;;  %v989_v44 = vmin.f32 %v987_v30, %v2515_v41  ;;  %v2518_v45 = vsub.f32 %v766_v42, %v604_v43  ;;  %v796_v30 = vpop.permute.xlu0 %795 }
 0x107   : > { %v606_v46 = vpop.f32.mrf.mxu0 }
 0x108   : > { %3534 = vst [vmem:[#allocation17_spill] sm:$0xff] %v2518_v45  ;;  %v2521_v47 = vmin.f32 %v951_v33, %v2518_v45  ;;  %v2523_v48 = vsub.f32 %v766_v42, %v606_v46  ;;  %v801_v33 = vpop.permute.xlu1 %800 }
 0x109   : > { %v608_v50 = vpop.f32.mrf.mxu0 }
 0x10a   : > { %3535 = vst [vmem:[#allocation18_spill] sm:$0xff] %v2523_v48  ;;  %v2526_v51 = vmin.f32 %v988_v37, %v2523_v48  ;;  %v2528_v52 = vsub.f32 %v771_v49, %v608_v50  ;;  %v806_v37 = vpop.permute.xlu0 %805 }
 0x10b   : > { %v610_v53 = vpop.f32.mrf.mxu0 }
 0x10c   : > { %3536 = vst [vmem:[#allocation19_spill] sm:$0xff] %v2528_v52  ;;  %v2531_v54 = vmin.f32 %v952_v40, %v2528_v52  ;;  %v2533_v55 = vsub.f32 %v771_v49, %v610_v53  ;;  %v811_v40 = vpop.permute.xlu1 %810 }
 0x10d   : > { %v614_v57 = vpop.f32.mrf.mxu0 }
 0x10e   : > { %3537 = vst [vmem:[#allocation20_spill] sm:$0xff] %v2533_v55  ;;  %v2536_v58 = vmin.f32 %v989_v44, %v2533_v55  ;;  %v2538_v59 = vsub.f32 %v776_v56, %v614_v57  ;;  %v816_v44 = vpop.permute.xlu0 %815 }
 0x10f   : > { %v616_v60 = vpop.f32.mrf.mxu0 }
 0x110   : > { %v2542_v1 = vsub.f32 %v776_v56, %v616_v60  ;;  %v821_v49 = vpop.permute.xlu1 %820 }
 0x111   : > { %v618_v2 = vpop.f32.mrf.mxu0 }
 0x112   : > { %v826_v56 = vpop.permute.xlu0 %825  ;;  %v2554_v20 = vsub.f32 %v781_v19, %v618_v2 }
 0x113   : > { %v620_v5 = vpop.f32.mrf.mxu0 }
 0x114   : > { %v831_v60 = vpop.permute.xlu1 %830  ;;  %v2556_v13 = vsub.f32 %v781_v19, %v620_v5  ;;  %v956_v2 = vmin.f32 %v2531_v54, %v2554_v20 }
 0x115   : > { %v624_v6 = vpop.f32.mrf.mxu0 }
 0x116   : > { %v836_v55 = vpop.permute.xlu0 %835  ;;  %3538 = vst [vmem:[#allocation21_spill] sm:$0xff] %v2556_v13  ;;  %v2560_v0 = vsub.f32 %v786_v23, %v624_v6  ;;  %v993_v6 = vmin.f32 %v2536_v58, %v2556_v13  ;;  %v3544_v58 = vmin.f32 %v2526_v51, %v2542_v1 }
 0x117   : > { %v626_v8 = vpop.f32.mrf.mxu0 }
 0x118   : > { %v841_v41 = vpop.permute.xlu1 %840  ;;  %v2564_v45 = vsub.f32 %v786_v23, %v626_v8 }
 0x119   : > { %v628_v10 = vpop.f32.mrf.mxu0 }
 0x11a   : > { %v846_v4 = vpop.permute.xlu0 %845  ;;  %v2562_v52 = vsub.f32 %v791_v26, %v628_v10  ;;  %3539 = vst [vmem:[#allocation22_spill] sm:$0xff] %v2564_v45 }
 0x11b   : > { %v630_v12 = vpop.f32.mrf.mxu0 }
 0x11c   : > { %v851_v38 = vpop.permute.xlu1 %850  ;;  %v2566_v31 = vsub.f32 %v791_v26, %v630_v12  ;;  %v3543_v12 = vmin.f32 %v2521_v47, %v2538_v59  ;;  %v958_v26 = vmin.f32 %v956_v2, %v2562_v52 }
 0x11d   : > { %v634_v14 = vpop.f32.mrf.mxu0 }
 0x11e   : > { %3540 = vst [vmem:[#allocation23_spill] sm:$0xff] %v2566_v31  ;;  %v2572_v17 = vsub.f32 %v796_v30, %v634_v14  ;;  %v957_v23 = vmin.f32 %v3543_v12, %v2560_v0 }
 0x11f   : > { %v636_v15 = vpop.f32.mrf.mxu0 }
 0x120   : > { %v2578_v19 = vsub.f32 %v796_v30, %v636_v15  ;;  %v994_v15 = vmin.f32 %v3544_v58, %v2564_v45  ;;  %v959_v12 = vmin.f32 %v957_v23, %v2572_v17  ;;  %v861_v13 = vpop.permute.xlu1 %860 }
 0x121   : > { %v638_v16 = vpop.f32.mrf.mxu0 }
 0x122   : > { %v2574_v5 = vsub.f32 %v801_v33, %v638_v16  ;;  %3541 = vst [vmem:[#allocation24_spill] sm:$0xff] %v2578_v19  ;;  %v995_v16 = vmin.f32 %v993_v6, %v2566_v31  ;;  %v996_v51 = vmin.f32 %v994_v15, %v2578_v19 }
 0x123   : > { %v640_v18 = vpop.f32.mrf.mxu0 }
 0x124   : > { %v2580_v10 = vsub.f32 %v801_v33, %v640_v18  ;;  %v856_v18 = vpop.permute.xlu0 %855 }
 0x125   : > { %v644_v21 = vpop.f32.mrf.mxu0 }
 0x126   : > { %3542 = vst [vmem:[#allocation25_spill] sm:$0xff] %v2580_v10  ;;  %v2587_v54 = vsub.f32 %v806_v37, %v644_v21  ;;  %v960_v21 = vmin.f32 %v958_v26, %v2574_v5  ;;  %v997_v58 = vmin.f32 %v995_v16, %v2580_v10 }
 0x127   : > { %v646_v22 = vpop.f32.mrf.mxu0 }
 0x128   : > { %v2596_v30 = vsub.f32 %v806_v37, %v646_v22  ;;  %v961_v37 = vmin.f32 %v959_v12, %v2587_v54 }
 0x129   : > { %v648_v25 = vpop.f32.mrf.mxu0 }
 0x12a   : > { %v2589_v14 = vsub.f32 %v811_v40, %v648_v25  ;;  %3545 = vst [vmem:[#allocation26_spill] sm:$0xff] %v2596_v30 }
 0x12b   : > { %v650_v28 = vpop.f32.mrf.mxu0 }
 0x12c   : > { %v2598_v33 = vsub.f32 %v811_v40, %v650_v28  ;;  %v962_v40 = vmin.f32 %v960_v21, %v2589_v14 }
 0x12d   : > { %v654_v29 = vpop.f32.mrf.mxu0 }
 0x12e   : > { %3546 = vst [vmem:[#allocation27_spill] sm:$0xff] %v2598_v33  ;;  %v2602_v2 = vsub.f32 %v816_v44, %v654_v29  ;;  %v999_v26 = vmin.f32 %v997_v58, %v2598_v33  ;;  %v871_v58 = vpop.permute.xlu1 %870 }
 0x12f   : > { %v656_v32 = vpop.f32.mrf.mxu0 }
 0x130   : > { %v2608_v6 = vsub.f32 %v816_v44, %v656_v32 }
 0x131   : > { %v658_v35 = vpop.f32.mrf.mxu0 }
 0x132   : > { %v2604_v25 = vsub.f32 %v821_v49, %v658_v35  ;;  %3547 = vst [vmem:[#allocation28_spill] sm:$0xff] %v2608_v6  ;;  %v998_v35 = vmin.f32 %v996_v51, %v2596_v30 }
 0x133   : > { %v660_v36 = vpop.f32.mrf.mxu0 }
 0x134   : > { %v2610_v22 = vsub.f32 %v821_v49, %v660_v36  ;;  %v963_v36 = vmin.f32 %v961_v37, %v2602_v2  ;;  %v964_v44 = vmin.f32 %v962_v40, %v2604_v25 }
 0x135   : > { %v664_v39 = vpop.f32.mrf.mxu0 }
 0x136   : > { %3548 = vst [vmem:[#allocation29_spill] sm:$0xff] %v2610_v22  ;;  %v2614_v23 = vsub.f32 %v826_v56, %v664_v39  ;;  %v866_v39 = vpop.permute.xlu0 %865  ;;  %v1001_v21 = vmin.f32 %v999_v26, %v2610_v22 }
 0x137   : > { %v666_v42 = vpop.f32.mrf.mxu0 }
 0x138   : > { %v2620_v15 = vsub.f32 %v826_v56, %v666_v42  ;;  %v965_v56 = vmin.f32 %v963_v36, %v2614_v23 }
 0x139   : > { %v668_v43 = vpop.f32.mrf.mxu0 }
 0x13a   : > { %v2616_v29 = vsub.f32 %v831_v60, %v668_v43  ;;  %3549 = vst [vmem:[#allocation30_spill] sm:$0xff] %v2620_v15  ;;  %v1000_v43 = vmin.f32 %v998_v35, %v2608_v6 }
 0x13b   : > { %v670_v46 = vpop.f32.mrf.mxu0 }
 0x13c   : > { %v2622_v16 = vsub.f32 %v831_v60, %v670_v46  ;;  %v966_v60 = vmin.f32 %v964_v44, %v2616_v29  ;;  %v1002_v37 = vmin.f32 %v1000_v43, %v2620_v15 }
 0x13d   : > { %v674_v50 = vpop.f32.mrf.mxu0 }
 0x13e   : > { %3550 = vst [vmem:[#allocation31_spill] sm:$0xff] %v2622_v16  ;;  %v2626_v49 = vsub.f32 %v836_v55, %v674_v50  ;;  %v1003_v40 = vmin.f32 %v1001_v21, %v2622_v16 }
 0x13f   : > { %v2546_v53 = vpop.f32.mrf.mxu0 }
 0x140   : > { %v2633_v51 = vsub.f32 %v836_v55, %v2546_v53  ;;  %v967_v53 = vmin.f32 %v965_v56, %v2626_v49 }
 0x141   : > { %v678_v57 = vpop.f32.mrf.mxu0 }
 0x142   : > { %v2628_v12 = vsub.f32 %v841_v41, %v678_v57  ;;  %3551 = vst [vmem:[#allocation32_spill] sm:$0xff] %v2633_v51  ;;  %v1004_v26 = vmin.f32 %v1002_v37, %v2633_v51 }
 0x143   : > { %v680_v3 = vpop.f32.mrf.mxu0 }
 0x144   : > { %v2635_v42 = vsub.f32 %v841_v41, %v680_v3  ;;  %v968_v35 = vmin.f32 %v966_v60, %v2628_v12 }
 0x145   : > { %v2548_v61 = vpop.f32.mrf.mxu0 }
 0x146   : > { %3552 = vst [vmem:[#allocation33_spill] sm:$0xff] %v2635_v42  ;;  %v2640_v50 = vsub.f32 %v846_v4, %v2548_v61  ;;  %v1005_v36 = vmin.f32 %v1003_v40, %v2635_v42 }
 0x147   : > { %v2550_v48 = vpop.f32.mrf.mxu0 }
 0x148   : > { %v2647_v55 = vsub.f32 %v846_v4, %v2550_v48 }
 0x149   : > { %v688_v34 = vpop.f32.mrf.mxu0 }
 0x14a   : > { %v2642_v57 = vsub.f32 %v851_v38, %v688_v34  ;;  %3553 = vst [vmem:[#allocation34_spill] sm:$0xff] %v2647_v55  ;;  %v1006_v21 = vmin.f32 %v1004_v26, %v2647_v55 }
 0x14b   : > { %v2552_v27 = vpop.f32.mrf.mxu0 }
 0x14c   : > { %v2650_v41 = vsub.f32 %v851_v38, %v2552_v27  ;;  %v969_v38 = vmin.f32 %v967_v53, %v2640_v50  ;;  %v970_v44 = vmin.f32 %v968_v35, %v2642_v57 }
 0x14d   : > { %v2558_v11 = vpop.f32.mrf.mxu0 }
 0x14e   : > { %3554 = vst [vmem:[#allocation35_spill] sm:$0xff] %v2650_v41  ;;  %v2655_v61 = vsub.f32 %v856_v18, %v2558_v11  ;;  %v1007_v56 = vmin.f32 %v1005_v36, %v2650_v41 }
 0x14f   : > { %v2568_v24 = vpop.f32.mrf.mxu0 }
 0x150   : > { %v2662_v4 = vsub.f32 %v856_v18, %v2568_v24 }
 0x151   : > { %v698_v8 = vpop.f32.mrf.mxu0 }
 0x152   : > { %v2657_v34 = vsub.f32 %v861_v13, %v698_v8  ;;  %3555 = vst [vmem:[#allocation36_spill] sm:$0xff] %v2662_v4  ;;  %v876_v8 = vpop.permute.xlu0 %875 }
 0x153   : > { %v700_v47 = vpop.f32.mrf.mxu0 }
 0x154   : > { %v2664_v48 = vsub.f32 %v861_v13, %v700_v47  ;;  %v971_v13 = vmin.f32 %v969_v38, %v2655_v61  ;;  %v972_v18 = vmin.f32 %v970_v44, %v2657_v34 }
 0x155   : > { %v704_v28 = vpop.f32.mrf.mxu0 }
 0x156   : > { %3556 = vst [vmem:[#allocation37_spill] sm:$0xff] %v2664_v48  ;;  %v2668_v43 = vsub.f32 %v866_v39, %v704_v28  ;;  %v881_v28 = vpop.permute.xlu1 %880  ;;  %v1009_v40 = vmin.f32 %v1007_v56, %v2664_v48 }
 0x157   : > { %v706_v32 = vpop.f32.mrf.mxu0 }
 0x158   : > { %3557 = vst [vmem:[#allocation38_spill] sm:$0xff] %v2668_v43  ;;  %v2674_v60 = vsub.f32 %v866_v39, %v706_v32  ;;  %v973_v35 = vmin.f32 %v971_v13, %v2668_v43 }
 0x159   : > { %v708_v46 = vpop.f32.mrf.mxu0 }
 0x15a   : > { %v2670_v11 = vsub.f32 %v871_v58, %v708_v46  ;;  %3559 = vst [vmem:[#allocation40_spill] sm:$0xff] %v2674_v60  ;;  %v1008_v46 = vmin.f32 %v1006_v21, %v2662_v4 }
 0x15b   : > { %v710_v3 = vpop.f32.mrf.mxu0 }
 0x15c   : > { %3558 = vst [vmem:[#allocation39_spill] sm:$0xff] %v2670_v11  ;;  %v2678_v47 = vsub.f32 %v871_v58, %v710_v3  ;;  %v974_v32 = vmin.f32 %v972_v18, %v2670_v11  ;;  %v1010_v36 = vmin.f32 %v1008_v46, %v2674_v60  ;;  %v3467_v46 = vlaneseq }
 0x15d   : > { %v714_v27 = vpop.f32.mrf.mxu0 }
 0x15e   : > { %3560 = vst [vmem:[#allocation41_spill] sm:$0xff] %v2678_v47  ;;  %v2680_v37 = vsub.f32 %v876_v8, %v714_v27  ;;  %v1011_v3 = vmin.f32 %v1009_v40, %v2678_v47 }
 0x15f   : > { %v716_v24 = vpop.f32.mrf.mxu0 }
 0x160   : > { %3561 = vst [vmem:[#allocation42_spill] sm:$0xff] %v2680_v37  ;;  %v2686_v39 = vsub.f32 %v876_v8, %v716_v24  ;;  %v975_v27 = vmin.f32 %v973_v35, %v2680_v37  ;;  %v2701_v35 = vshrl.u32 %v3467_v46, 7 }
 0x161   : > { %v718_v53 = vpop.f32.mrf.mxu0 }
 0x162   : > { %3562 = vst [vmem:[#allocation43_spill] sm:$0xff] %v2686_v39  ;;  %v2688_v26 = vsub.f32 %v881_v28, %v718_v53  ;;  %v1012_v21 = vmin.f32 %v1010_v36, %v2686_v39  ;;  %v3569_v36 = vld [vmem:[#allocation17_spill] sm:$0xff]  ;;  %v2753_v46 = vadd.s32 80, %v2701_v35  ;;  %v2759_v39 = vadd.s32 96, %v2701_v35 }
 0x163   : > { %v720_v58 = vpop.f32.mrf.mxu0  ;;  %v2762_v47 = vadd.s32 104, %v2701_v35  ;;  %v2765_v41 = vadd.s32 112, %v2701_v35  ;;  %v2768_v55 = vadd.s32 120, %v2701_v35  ;;  %v2771_v51 = vadd.s32 128, %v2701_v35 }
 0x164   : > { %3563 = vst [vmem:[#allocation44_spill] sm:$0xff] %v2688_v26  ;;  %v976_v38 = vmin.f32 %v974_v32, %v2688_v26  ;;  %v2694_v44 = vsub.f32 %v881_v28, %v720_v58  ;;  %v3565_v32 = vld [vmem:[#allocation9_spill] sm:$0xff]  ;;  %v3570_v58 = vld [vmem:[#allocation19_spill] sm:$0xff]  ;;  %v2774_v16 = vadd.s32 136, %v2701_v35  ;;  %v2777_v15 = vadd.s32 144, %v2701_v35 }
 0x165   : > { %v2780_v22 = vadd.s32 152, %v2701_v35  ;;  %v2783_v6 = vadd.s32 160, %v2701_v35  ;;  %v2786_v33 = vadd.s32 168, %v2701_v35  ;;  %v2795_v30 = vadd.s32 192, %v2701_v35 }
 0x166   : > { %3564 = vst [vmem:[#allocation45_spill] sm:$0xff] %v2694_v44  ;;  %v977_v56 = vmin.f32 %v975_v27, %v976_v38  ;;  %v1013_v13 = vmin.f32 %v1011_v3, %v2694_v44  ;;  %v2726_v27 = vadd.s32 8, %v2701_v35  ;;  %v2729_v38 = vadd.s32 16, %v2701_v35 }
 0x167   : > { %v2756_v44 = vadd.s32 88, %v2701_v35  ;;  %v2798_v10 = vadd.s32 200, %v2701_v35  ;;  %v2801_v19 = vadd.s32 208, %v2701_v35  ;;  %v2804_v31 = vadd.s32 216, %v2701_v35 }
 0x168   : > { %v978_v8 = vrot.slane %v977_v56, 4  ;;  %v1014_v24 = vmin.f32 %v1012_v21, %v1013_v13  ;;  %v2732_v21 = vadd.s32 24, %v2701_v35  ;;  %v2738_v13 = vadd.s32 40, %v2701_v35 }
 0x169   : > { %3575 = vst [vmem:[#allocation17_spill] sm:$0xff] %v2804_v31  ;;  %v2807_v45 = vadd.s32 224, %v2701_v35  ;;  %v2810_v26 = vadd.s32 232, %v2701_v35  ;;  %v2813_v37 = vadd.s32 240, %v2701_v35 }
 0x16a   : > { %v979_v18 = vmin.f32 %v977_v56, %v978_v8  ;;  %v1015_v60 = vrot.slane %v1014_v24, 4  ;;  %v2735_v56 = vadd.s32 32, %v2701_v35  ;;  %v2741_v8 = vadd.s32 48, %v2701_v35 }
 0x16b   : > { %3576 = vst [vmem:[#allocation19_spill] sm:$0xff] %v2807_v45  ;;  %3577 = vst [vmem:[#allocation46_spill] sm:$0xff] %v2810_v26  ;;  %v2832_v26 = vadd.s32 248, %v2701_v35 }
 0x16c   : > { %v980_v53 = vrot.slane %v979_v18, 2  ;;  %v1016_v28 = vmin.f32 %v1014_v24, %v1015_v60  ;;  %v3568_v60 = vld [vmem:[#allocation15_spill] sm:$0xff]  ;;  %3571 = vst [vmem:[#allocation9_spill] sm:$0xff] %v2735_v56  ;;  %v2744_v24 = vadd.s32 56, %v2701_v35  ;;  %3578 = vst [vmem:[#allocation47_spill] sm:$0xff] %v2813_v37 }
 0x16e   : > { %v981_v48 = vmin.f32 %v979_v18, %v980_v53  ;;  %v1017_v3 = vrot.slane %v1016_v28, 2  ;;  %v2747_v18 = vadd.s32 64, %v2701_v35  ;;  %v2750_v53 = vadd.s32 72, %v2701_v35 }
 0x170   : > { %v982_v4 = vrot.slane %v981_v48, 1  ;;  %3574 = vst [vmem:[#allocation15_spill] sm:$0xff] %v2750_v53  ;;  %v1018_v42 = vmin.f32 %v1016_v28, %v1017_v3  ;;  %v2789_v28 = vadd.s32 176, %v2701_v35  ;;  %v2792_v3 = vadd.s32 184, %v2701_v35 }
 0x172   : > { %v2698_v40 = vmin.f32 %v981_v48, %v982_v4  ;;  %v3566_v4 = vld [vmem:[#allocation11_spill] sm:$0xff]  ;;  %v3567_v48 = vld [vmem:[#allocation13_spill] sm:$0xff]  ;;  %v1019_v11 = vrot.slane %v1018_v42, 1 }
 0x173   : > { %3572 = vst [vmem:[#allocation11_spill] sm:$0xff] %v2744_v24  ;;  %3573 = vst [vmem:[#allocation13_spill] sm:$0xff] %v2747_v18 }
 0x174   : > { %vm1054_vm1 = vcmp.eq.f32.partialorder %v2470_v62, %v2698_v40  ;;  %vm1056_vm2 = vcmp.eq.f32.partialorder %v2480_v7, %v2698_v40  ;;  %vm1058_vm3 = vcmp.eq.f32.partialorder %v2472_v63, %v2698_v40  ;;  %vm1060_vm4 = vcmp.eq.f32.partialorder %v2484_v9, %v2698_v40 }
 0x175   : > { %vm1062_vm5 = vcmp.eq.f32.partialorder %v3565_v32, %v2698_v40  ;;  %vm1064_vm6 = vcmp.eq.f32.partialorder %v3566_v4, %v2698_v40  ;;  %vm1066_vm7 = vcmp.eq.f32.partialorder %v3567_v48, %v2698_v40  ;;  %vm1068_vm8 = vcmp.eq.f32.partialorder %v3568_v60, %v2698_v40 }
 0x176   : > { %vm1070_vm9 = vcmp.eq.f32.partialorder %v3569_v36, %v2698_v40  ;;  %vm1072_vm10 = vcmp.eq.f32.partialorder %v3570_v58, %v2698_v40  ;;  %vm1074_vm11 = vcmp.eq.f32.partialorder %v2538_v59, %v2698_v40  ;;  %v1118_v43 = vsel %vm1054_vm1, %v2701_v35, 256  ;;  %v3579_v36 = vld [vmem:[#allocation5_spill] sm:$0xff]  ;;  %v3581_v58 = vld [vmem:[#allocation6_spill] sm:$0xff] }
 0x177   : > { %v1120_v31 = vsel %vm1056_vm2, %v2726_v27, 256  ;;  %v1122_v45 = vsel %vm1058_vm3, %v2729_v38, 256  ;;  %v1124_v37 = vsel %vm1060_vm4, %v2732_v21, 256  ;;  %vm1076_vm12 = vcmp.eq.f32.partialorder %v2554_v20, %v2698_v40 }
 0x178   : > { %vm1078_vm13 = vcmp.eq.f32.partialorder %v2560_v0, %v2698_v40  ;;  %vm1080_vm14 = vcmp.eq.f32.partialorder %v2562_v52, %v2698_v40  ;;  %v1126_v62 = vsel %vm1062_vm5, %v2735_v56, 256  ;;  %v1128_v63 = vsel %vm1064_vm6, %v2738_v13, 256 }
 0x179   : > { %v1130_v7 = vsel %vm1066_vm7, %v2741_v8, 256  ;;  %v1132_v9 = vsel %vm1068_vm8, %v2744_v24, 256  ;;  %v1134_v32 = vsel %vm1070_vm9, %v2747_v18, 256  ;;  %vm1182_vm15 = vcmp.lt.s32.totalorder %v1118_v43, %v1122_v45 }
 0x17a   : > { %vm1184_vm0 = vcmp.lt.s32.totalorder %v1120_v31, %v1124_v37  ;;  %v2860_v56 = vmin.f32 %v1018_v42, %v1019_v11  ;;  %v1136_v4 = vsel %vm1072_vm10, %v2750_v53, 256  ;;  %v1138_v48 = vsel %vm1074_vm11, %v2753_v46, 256  ;;  %v3580_v42 = vld [vmem:[#allocation7_spill] sm:$0xff]  ;;  %v3582_v53 = vld [vmem:[#allocation8_spill] sm:$0xff] }
 0x17b   : > { %v1183_v60 = vsel %vm1182_vm15, %v1118_v43, %v1122_v45  ;;  %v1185_v24 = vsel %vm1184_vm0, %v1120_v31, %v1124_v37  ;;  %v3583_v31 = vld [vmem:[#allocation10_spill] sm:$0xff]  ;;  %v3584_v45 = vld [vmem:[#allocation12_spill] sm:$0xff]  ;;  %vm1084_vm15 = vcmp.eq.f32.partialorder %v2574_v5, %v2698_v40  ;;  %v1144_v20 = vsel %vm1080_vm14, %v2762_v47, 256 }
 0x17c   : > { %vm1186_vm1 = vcmp.lt.s32.totalorder %v1183_v60, %v1126_v62  ;;  %vm1188_vm2 = vcmp.lt.s32.totalorder %v1185_v24, %v1128_v63  ;;  %vm1055_vm3 = vcmp.eq.f32.partialorder %v3579_v36, %v2860_v56  ;;  %vm1057_vm4 = vcmp.eq.f32.partialorder %v3580_v42, %v2860_v56  ;;  %v3585_v37 = vld [vmem:[#allocation14_spill] sm:$0xff]  ;;  %v3598_v36 = vld [vmem:[#allocation21_spill] sm:$0xff] }
 0x17d   : > { %v1187_v11 = vsel %vm1186_vm1, %v1183_v60, %v1126_v62  ;;  %v1189_v18 = vsel %vm1188_vm2, %v1185_v24, %v1128_v63  ;;  %vm1059_vm5 = vcmp.eq.f32.partialorder %v3581_v58, %v2860_v56  ;;  %vm1063_vm9 = vcmp.eq.f32.partialorder %v3583_v31, %v2860_v56  ;;  %v3586_v24 = vld [vmem:[#allocation16_spill] sm:$0xff]  ;;  %v3587_v62 = vld [vmem:[#allocation18_spill] sm:$0xff]  ;;  %v3602_v42 = vld [vmem:[#allocation25_spill] sm:$0xff] }
 0x17e   : > { %vm1190_vm7 = vcmp.lt.s32.totalorder %v1187_v11, %v1130_v7  ;;  %vm1192_vm8 = vcmp.lt.s32.totalorder %v1189_v18, %v1132_v9  ;;  %vm1065_vm10 = vcmp.eq.f32.partialorder %v3584_v45, %v2860_v56  ;;  %v3588_v63 = vld [vmem:[#allocation20_spill] sm:$0xff]  ;;  %v1142_v60 = vsel %vm1078_vm13, %v2759_v39, 256 }
 0x17f   : > { %v1191_v59 = vsel %vm1190_vm7, %v1187_v11, %v1130_v7  ;;  %v1193_v43 = vsel %vm1192_vm8, %v1189_v18, %v1132_v9  ;;  %v1140_v7 = vsel %vm1076_vm12, %v2756_v44, 256  ;;  %vm1082_vm8 = vcmp.eq.f32.partialorder %v2572_v17, %v2698_v40 }
 0x180   : > { %vm1194_vm0 = vcmp.lt.s32.totalorder %v1191_v59, %v1134_v32  ;;  %vm1196_vm1 = vcmp.lt.s32.totalorder %v1193_v43, %v1136_v4  ;;  %vm1086_vm12 = vcmp.eq.f32.partialorder %v2587_v54, %v2698_v40  ;;  %v1146_v17 = vsel %vm1082_vm8, %v2765_v41, 256 }
 0x181   : > { %v1195_v18 = vsel %vm1194_vm0, %v1191_v59, %v1134_v32  ;;  %v1197_v9 = vsel %vm1196_vm1, %v1193_v43, %v1136_v4  ;;  %vm1088_vm0 = vcmp.eq.f32.partialorder %v2589_v14, %v2698_v40  ;;  %v1148_v0 = vsel %vm1084_vm15, %v2768_v55, 256  ;;  %v364_v59 = vld [vmem:[%s3422_s2 + $0x8] sm:$0xff] }
 0x182   : > { %vm1198_vm2 = vcmp.lt.s32.totalorder %v1195_v18, %v1138_v48  ;;  %vm1200_vm11 = vcmp.lt.s32.totalorder %v1197_v9, %v1140_v7  ;;  %vm1090_vm13 = vcmp.eq.f32.partialorder %v2602_v2, %v2698_v40  ;;  %vm1092_vm14 = vcmp.eq.f32.partialorder %v2604_v25, %v2698_v40  ;;  %1600 = vmatprep.mubr.f32.mxu1 %v364_v59 }
 0x183   : > { %v1199_v32 = vsel %vm1198_vm2, %v1195_v18, %v1138_v48  ;;  %v1201_v4 = vsel %vm1200_vm11, %v1197_v9, %v1140_v7  ;;  %v1150_v52 = vsel %vm1086_vm12, %v2771_v51, 256  ;;  %v1152_v54 = vsel %vm1088_vm0, %v2774_v16, 256 }
 0x184   : > { %vm1202_vm1 = vcmp.lt.s32.totalorder %v1199_v32, %v1142_v60  ;;  %vm1204_vm7 = vcmp.lt.s32.totalorder %v1201_v4, %v1144_v20  ;;  %vm1094_vm15 = vcmp.eq.f32.partialorder %v2614_v23, %v2698_v40  ;;  %v1154_v2 = vsel %vm1090_vm13, %v2777_v15, 256 }
 0x185   : > { %v1203_v5 = vsel %vm1202_vm1, %v1199_v32, %v1142_v60  ;;  %v1205_v11 = vsel %vm1204_vm7, %v1201_v4, %v1144_v20  ;;  %vm1096_vm7 = vcmp.eq.f32.partialorder %v2616_v29, %v2698_v40  ;;  %v1156_v25 = vsel %vm1092_vm14, %v2780_v22, 256 }
 0x186   : > { %vm1206_vm11 = vcmp.lt.s32.totalorder %v1203_v5, %v1146_v17  ;;  %vm1208_vm2 = vcmp.lt.s32.totalorder %v1205_v11, %v1148_v0  ;;  %vm1098_vm12 = vcmp.eq.f32.partialorder %v2626_v49, %v2698_v40  ;;  %vm1100_vm0 = vcmp.eq.f32.partialorder %v2628_v12, %v2698_v40 }
 0x187   : > { %v1207_v14 = vsel %vm1206_vm11, %v1203_v5, %v1146_v17  ;;  %v1209_v48 = vsel %vm1208_vm2, %v1205_v11, %v1148_v0  ;;  %v1158_v23 = vsel %vm1094_vm15, %v2783_v6, 256  ;;  %v1160_v29 = vsel %vm1096_vm7, %v2786_v33, 256  ;;  %v3589_v17 = vld [vmem:[#allocation38_spill] sm:$0xff]  ;;  %v3590_v0 = vld [vmem:[#allocation39_spill] sm:$0xff]  ;;  %v3591_v5 = vld [vmem:[#allocation17_spill] sm:$0xff] }
 0x188   : > { %vm1210_vm8 = vcmp.lt.s32.totalorder %v1207_v14, %v1150_v52  ;;  %vm1212_vm1 = vcmp.lt.s32.totalorder %v1209_v48, %v1152_v54  ;;  %vm1102_vm13 = vcmp.eq.f32.partialorder %v2640_v50, %v2698_v40  ;;  %vm1104_vm14 = vcmp.eq.f32.partialorder %v2642_v57, %v2698_v40 }
 0x189   : > { %v1211_v43 = vsel %vm1210_vm8, %v1207_v14, %v1150_v52  ;;  %v1213_v7 = vsel %vm1212_vm1, %v1209_v48, %v1152_v54  ;;  %v1162_v49 = vsel %vm1098_vm12, %v2789_v28, 256  ;;  %v1164_v12 = vsel %vm1100_vm0, %v2792_v3, 256  ;;  %v3592_v54 = vld [vmem:[#allocation42_spill] sm:$0xff]  ;;  %v3593_v14 = vld [vmem:[#allocation44_spill] sm:$0xff]  ;;  %v3594_v48 = vld [vmem:[#allocation19_spill] sm:$0xff] }
 0x18a   : > { %vm1214_vm11 = vcmp.lt.s32.totalorder %v1211_v43, %v1154_v2  ;;  %vm1216_vm2 = vcmp.lt.s32.totalorder %v1213_v7, %v1156_v25  ;;  %vm1106_vm15 = vcmp.eq.f32.partialorder %v2655_v61, %v2698_v40  ;;  %vm1108_vm7 = vcmp.eq.f32.partialorder %v2657_v34, %v2698_v40 }
 0x18b   : > { %v1215_v18 = vsel %vm1214_vm11, %v1211_v43, %v1154_v2  ;;  %v1217_v9 = vsel %vm1216_vm2, %v1213_v7, %v1156_v25  ;;  %v1166_v50 = vsel %vm1102_vm13, %v2795_v30, 256  ;;  %v1168_v57 = vsel %vm1104_vm14, %v2798_v10, 256  ;;  %v3595_v2 = vld [vmem:[#allocation46_spill] sm:$0xff] }
 0x18c   : > { %vm1218_vm8 = vcmp.lt.s32.totalorder %v1215_v18, %v1158_v23  ;;  %vm1220_vm1 = vcmp.lt.s32.totalorder %v1217_v9, %v1160_v29  ;;  %vm1110_vm12 = vcmp.eq.f32.partialorder %v3589_v17, %v2698_v40  ;;  %vm1112_vm0 = vcmp.eq.f32.partialorder %v3590_v0, %v2698_v40  ;;  %v3600_v17 = vld [vmem:[#allocation23_spill] sm:$0xff]  ;;  %v3601_v0 = vld [vmem:[#allocation24_spill] sm:$0xff] }
 0x18d   : > { %v1219_v60 = vsel %vm1218_vm8, %v1215_v18, %v1158_v23  ;;  %v1221_v20 = vsel %vm1220_vm1, %v1217_v9, %v1160_v29  ;;  %v1170_v61 = vsel %vm1106_vm15, %v2801_v19, 256  ;;  %v1172_v34 = vsel %vm1108_vm7, %v3591_v5, 256  ;;  %v3596_v23 = vld [vmem:[#allocation47_spill] sm:$0xff] }
 0x18e   : > { %vm1222_vm11 = vcmp.lt.s32.totalorder %v1219_v60, %v1162_v49  ;;  %vm1224_vm2 = vcmp.lt.s32.totalorder %v1221_v20, %v1164_v12  ;;  %vm1114_vm13 = vcmp.eq.f32.partialorder %v3592_v54, %v2698_v40  ;;  %vm1116_vm14 = vcmp.eq.f32.partialorder %v3593_v14, %v2698_v40 }
 0x18f   : > { %v1223_v32 = vsel %vm1222_vm11, %v1219_v60, %v1162_v49  ;;  %v1225_v4 = vsel %vm1224_vm2, %v1221_v20, %v1164_v12  ;;  %v1174_v59 = vsel %vm1110_vm12, %v3594_v48, 256  ;;  %v1176_v25 = vsel %vm1112_vm0, %v3595_v2, 256 }
 0x190   : > { %vm1226_vm8 = vcmp.lt.s32.totalorder %v1223_v32, %v1166_v50  ;;  %vm1228_vm1 = vcmp.lt.s32.totalorder %v1225_v4, %v1168_v57  ;;  %v1178_v29 = vsel %vm1114_vm13, %v3596_v23, 256  ;;  %v1180_v18 = vsel %vm1116_vm14, %v2832_v26, 256 }
 0x191   : > { %v1227_v11 = vsel %vm1226_vm8, %v1223_v32, %v1166_v50  ;;  %v1229_v52 = vsel %vm1228_vm1, %v1225_v4, %v1168_v57  ;;  %v1119_v60 = vsel %vm1055_vm3, %v2701_v35, 256  ;;  %v1123_v20 = vsel %vm1059_vm5, %v2729_v38, 256  ;;  %v3599_v4 = vld [vmem:[#allocation22_spill] sm:$0xff] }
 0x192   : > { %vm1230_vm11 = vcmp.lt.s32.totalorder %v1227_v11, %v1170_v61  ;;  %vm1232_vm2 = vcmp.lt.s32.totalorder %v1229_v52, %v1172_v34  ;;  %v1121_v50 = vsel %vm1057_vm4, %v2726_v27, 256  ;;  %vm1077_vm3 = vcmp.eq.f32.partialorder %v3598_v36, %v2860_v56 }
 0x193   : > { %v1231_v43 = vsel %vm1230_vm11, %v1227_v11, %v1170_v61  ;;  %v1233_v7 = vsel %vm1232_vm2, %v1229_v52, %v1172_v34  ;;  %vm1079_vm0 = vcmp.eq.f32.partialorder %v3599_v4, %v2860_v56  ;;  %vm1081_vm5 = vcmp.eq.f32.partialorder %v3600_v17, %v2860_v56  ;;  %v3604_v11 = vld [vmem:[#allocation26_spill] sm:$0xff] }
 0x194   : > { %vm1234_vm6 = vcmp.lt.s32.totalorder %v1231_v43, %v1174_v59  ;;  %vm1236_vm15 = vcmp.lt.s32.totalorder %v1233_v7, %v1176_v25  ;;  %vm1083_vm1 = vcmp.eq.f32.partialorder %v3601_v0, %v2860_v56  ;;  %vm1253_vm4 = vcmp.lt.s32.totalorder %v1119_v60, %v1123_v20 }
 0x195   : > { %v1235_v9 = vsel %vm1234_vm6, %v1231_v43, %v1174_v59  ;;  %v1237_v49 = vsel %vm1236_vm15, %v1233_v7, %v1176_v25  ;;  %vm3597_vm6 = vcmp.eq.f32.partialorder %v3582_v53, %v2860_v56  ;;  %vm1085_vm13 = vcmp.eq.f32.partialorder %v3602_v42, %v2860_v56  ;;  %v3603_v53 = vld [vmem:[#allocation9_spill] sm:$0xff]  ;;  %v3605_v59 = vld [vmem:[#allocation27_spill] sm:$0xff] }
 0x196   : > { %vm1238_vm7 = vcmp.lt.s32.totalorder %v1235_v9, %v1178_v29  ;;  %vm1240_vm8 = vcmp.lt.s32.totalorder %v1237_v49, %v1180_v18  ;;  %v1125_v57 = vsel %vm3597_vm6, %v2732_v21, 256  ;;  %v1127_v61 = vsel %vm1063_vm9, %v3603_v53, 256  ;;  %v3607_v7 = vld [vmem:[#allocation11_spill] sm:$0xff] }
 0x197   : > { %v1239_v12 = vsel %vm1238_vm7, %v1235_v9, %v1178_v29  ;;  %v1241_v40 = vsel %vm1240_vm8, %v1237_v49, %v1180_v18  ;;  %v1254_v34 = vsel %vm1253_vm4, %v1119_v60, %v1123_v20  ;;  %vm1255_vm14 = vcmp.lt.s32.totalorder %v1121_v50, %v1125_v57  ;;  %v3609_v18 = vld [vmem:[#allocation28_spill] sm:$0xff]  ;;  %v3610_v9 = vld [vmem:[#allocation13_spill] sm:$0xff] }
 0x198   : > { %vm1242_vm12 = vcmp.lt.s32.totalorder %v1239_v12, %v1241_v40  ;;  %vm1087_vm2 = vcmp.eq.f32.partialorder %v3604_v11, %v2860_v56  ;;  %v1129_v52 = vsel %vm1065_vm10, %v2738_v13, 256  ;;  %v1256_v54 = vsel %vm1255_vm14, %v1121_v50, %v1125_v57 }
 0x199   : > { %v1243_v32 = vsel %vm1242_vm12, %v1239_v12, %v1241_v40  ;;  %vm1257_vm15 = vcmp.lt.s32.totalorder %v1254_v34, %v1127_v61  ;;  %vm1089_vm7 = vcmp.eq.f32.partialorder %v3605_v59, %v2860_v56  ;;  %vm3606_vm9 = vcmp.eq.f32.partialorder %v3585_v37, %v2860_v56  ;;  %v3612_v12 = vld [vmem:[#allocation15_spill] sm:$0xff] }
 0x19a   : > { %v1244_v58 = vrot.slane %v1243_v32, 4  ;;  %v1131_v31 = vsel %vm3606_vm9, %v2741_v8, 256  ;;  %v1258_v25 = vsel %vm1257_vm15, %v1254_v34, %v1127_v61  ;;  %vm1259_vm8 = vcmp.lt.s32.totalorder %v1256_v54, %v1129_v52  ;;  %v3616_v61 = vld [vmem:[#allocation30_spill] sm:$0xff] }
 0x19b   : > { %vm3608_vm12 = vcmp.eq.f32.partialorder %v3586_v24, %v2860_v56  ;;  %v1260_v29 = vsel %vm1259_vm8, %v1256_v54, %v1129_v52  ;;  %vm1261_vm10 = vcmp.lt.s32.totalorder %v1258_v25, %v1131_v31  ;;  %vm1091_vm6 = vcmp.eq.f32.partialorder %v3609_v18, %v2860_v56  ;;  %v3617_v54 = vld [vmem:[#allocation31_spill] sm:$0xff] }
 0x19c   : > { %vm1245_vm11 = vcmp.lt.s32.totalorder %v1243_v32, %v1244_v58  ;;  %v1133_v45 = vsel %vm3608_vm12, %v3607_v7, 256  ;;  %vm3611_vm4 = vcmp.eq.f32.partialorder %v3587_v62, %v2860_v56  ;;  %v1262_v37 = vsel %vm1261_vm10, %v1258_v25, %v1131_v31  ;;  %v3618_v31 = vld [vmem:[#allocation32_spill] sm:$0xff]  ;;  %v3621_v18 = vld [vmem:[#allocation35_spill] sm:$0xff] }
 0x19d   : > { %v1246_v14 = vsel %vm1245_vm11, %v1243_v32, %v1244_v58  ;;  %v1135_v49 = vsel %vm3611_vm4, %v3610_v9, 256  ;;  %vm1263_vm14 = vcmp.lt.s32.totalorder %v1260_v29, %v1133_v45  ;;  %vm3613_vm15 = vcmp.eq.f32.partialorder %v3588_v63, %v2860_v56  ;;  %v3615_v63 = vld [vmem:[#allocation29_spill] sm:$0xff] }
 0x19e   : > { %v1247_v43 = vrot.slane %v1246_v14, 2  ;;  %v1137_v40 = vsel %vm3613_vm15, %v3612_v12, 256  ;;  %v1264_v24 = vsel %vm1263_vm14, %v1260_v29, %v1133_v45  ;;  %vm1265_vm9 = vcmp.lt.s32.totalorder %v1262_v37, %v1135_v49  ;;  %v3619_v29 = vld [vmem:[#allocation33_spill] sm:$0xff] }
 0x19f   : > { %vm3614_vm8 = vcmp.eq.f32.partialorder %v2542_v1, %v2860_v56  ;;  %v1266_v50 = vsel %vm1265_vm9, %v1262_v37, %v1135_v49  ;;  %vm1267_vm12 = vcmp.lt.s32.totalorder %v1264_v24, %v1137_v40  ;;  %v1141_v57 = vsel %vm1077_vm3, %v2756_v44, 256  ;;  %v3620_v37 = vld [vmem:[#allocation34_spill] sm:$0xff] }
 0x1a0   : > { %vm1248_vm11 = vcmp.lt.s32.totalorder %v1246_v14, %v1247_v43  ;;  %v1139_v20 = vsel %vm3614_vm8, %v2753_v46, 256  ;;  %v1268_v32 = vsel %vm1267_vm12, %v1264_v24, %v1137_v40  ;;  %vm1093_vm4 = vcmp.eq.f32.partialorder %v3615_v63, %v2860_v56  ;;  %v3623_v63 = vld [vmem:[#allocation37_spill] sm:$0xff] }
 0x1a1   : > { %v1249_v60 = vsel %vm1248_vm11, %v1246_v14, %v1247_v43  ;;  %vm1269_vm10 = vcmp.lt.s32.totalorder %v1266_v50, %v1139_v20  ;;  %v1143_v58 = vsel %vm1079_vm0, %v2759_v39, 256  ;;  %vm1271_vm14 = vcmp.lt.s32.totalorder %v1268_v32, %v1141_v57 }
 0x1a2   : > { %v1250_v62 = vrot.slane %v1249_v60, 1  ;;  %v1270_v1 = vsel %vm1269_vm10, %v1266_v50, %v1139_v20  ;;  %vm1095_vm11 = vcmp.eq.f32.partialorder %v3616_v61, %v2860_v56  ;;  %v1145_v36 = vsel %vm1081_vm5, %v2762_v47, 256  ;;  %v3624_v61 = vld [vmem:[#allocation40_spill] sm:$0xff] }
 0x1a3   : > { %v1272_v34 = vsel %vm1271_vm14, %v1268_v32, %v1141_v57  ;;  %vm1273_vm3 = vcmp.lt.s32.totalorder %v1270_v1, %v1143_v58  ;;  %v1147_v52 = vsel %vm1083_vm1, %v2765_v41, 256  ;;  %vm1097_vm9 = vcmp.eq.f32.partialorder %v3617_v54, %v2860_v56  ;;  %v3625_v54 = vld [vmem:[#allocation41_spill] sm:$0xff] }
 0x1a4   : > { %vm1251_vm15 = vcmp.lt.s32.totalorder %v1249_v60, %v1250_v62  ;;  %v1274_v4 = vsel %vm1273_vm3, %v1270_v1, %v1143_v58  ;;  %vm1275_vm0 = vcmp.lt.s32.totalorder %v1272_v34, %v1145_v36  ;;  %v1149_v14 = vsel %vm1085_vm13, %v2768_v55, 256 }
 0x1a5   : > { %v1276_v17 = vsel %vm1275_vm0, %v1272_v34, %v1145_v36  ;;  %vm1277_vm5 = vcmp.lt.s32.totalorder %v1274_v4, %v1147_v52  ;;  %vm1099_vm8 = vcmp.eq.f32.partialorder %v3618_v31, %v2860_v56  ;;  %v1151_v0 = vsel %vm1087_vm2, %v2771_v51, 256  ;;  %v3626_v31 = vld [vmem:[#allocation43_spill] sm:$0xff] }
 0x1a6   : > { %v1278_v25 = vsel %vm1277_vm5, %v1274_v4, %v1147_v52  ;;  %vm1279_vm1 = vcmp.lt.s32.totalorder %v1276_v17, %v1149_v14  ;;  %v3053_v43 = vsel %vm1251_vm15, %v1249_v60, %v1250_v62  ;;  %v1153_v42 = vsel %vm1089_vm7, %v2774_v16, 256  ;;  %v3622_v62 = vld [vmem:[#allocation36_spill] sm:$0xff] }
 0x1a7   : > { %v1280_v45 = vsel %vm1279_vm1, %v1276_v17, %v1149_v14  ;;  %vm1281_vm13 = vcmp.lt.s32.totalorder %v1278_v25, %v1151_v0  ;;  %vm1101_vm12 = vcmp.eq.f32.partialorder %v3619_v29, %v2860_v56  ;;  %v1155_v11 = vsel %vm1091_vm6, %v2777_v15, 256 }
 0x1a8   : > { %v1282_v49 = vsel %vm1281_vm13, %v1278_v25, %v1151_v0  ;;  %vm1283_vm2 = vcmp.lt.s32.totalorder %v1280_v45, %v1153_v42  ;;  %vm1103_vm10 = vcmp.eq.f32.partialorder %v3620_v37, %v2860_v56  ;;  %v1157_v59 = vsel %vm1093_vm4, %v2780_v22, 256 }
 0x1a9   : > { %v1284_v40 = vsel %vm1283_vm2, %v1280_v45, %v1153_v42  ;;  %vm1285_vm7 = vcmp.lt.s32.totalorder %v1282_v49, %v1155_v11  ;;  %v1159_v24 = vsel %vm1095_vm11, %v2783_v6, 256  ;;  %vm1354_vm6 = vcmp.eq.s32.totalorder %v2738_v13, %v3053_v43  ;;  %v3627_v42 = vld [vmem:[#allocation45_spill] sm:$0xff] }
 0x1aa   : > { %v1286_v60 = vsel %vm1285_vm7, %v1282_v49, %v1155_v11  ;;  %vm1287_vm14 = vcmp.lt.s32.totalorder %v1284_v40, %v1157_v59  ;;  %vm1105_vm3 = vcmp.eq.f32.partialorder %v3621_v18, %v2860_v56  ;;  %v1161_v20 = vsel %vm1097_vm9, %v2786_v33, 256 }
 0x1ab   : > { %v1288_v50 = vsel %vm1287_vm14, %v1284_v40, %v1157_v59  ;;  %vm1289_vm4 = vcmp.lt.s32.totalorder %v1286_v60, %v1159_v24  ;;  %vm1107_vm15 = vcmp.eq.f32.partialorder %v3622_v62, %v2860_v56  ;;  %v1163_v57 = vsel %vm1099_vm8, %v2789_v28, 256 }
 0x1ac   : > { %v1290_v32 = vsel %vm1289_vm4, %v1286_v60, %v1159_v24  ;;  %vm1291_vm11 = vcmp.lt.s32.totalorder %v1288_v50, %v1161_v20  ;;  %vm1109_vm0 = vcmp.eq.f32.partialorder %v3623_v63, %v2860_v56  ;;  %v1165_v58 = vsel %vm1101_vm12, %v2792_v3, 256 }
 0x1ad   : > { %v1292_v1 = vsel %vm1291_vm11, %v1288_v50, %v1161_v20  ;;  %vm1293_vm9 = vcmp.lt.s32.totalorder %v1290_v32, %v1163_v57  ;;  %vm1111_vm5 = vcmp.eq.f32.partialorder %v3624_v61, %v2860_v56  ;;  %v1167_v36 = vsel %vm1103_vm10, %v2795_v30, 256 }
 0x1ae   : > { %v1294_v34 = vsel %vm1293_vm9, %v1290_v32, %v1163_v57  ;;  %vm1295_vm8 = vcmp.lt.s32.totalorder %v1292_v1, %v1165_v58  ;;  %v1169_v52 = vsel %vm1105_vm3, %v2798_v10, 256  ;;  %vm1396_vm13 = vcmp.eq.s32.totalorder %v2801_v19, %v3053_v43 }
 0x1af   : > { %v1296_v4 = vsel %vm1295_vm8, %v1292_v1, %v1165_v58  ;;  %vm1297_vm1 = vcmp.lt.s32.totalorder %v1294_v34, %v1167_v36  ;;  %vm1113_vm12 = vcmp.eq.f32.partialorder %v3625_v54, %v2860_v56  ;;  %v1171_v14 = vsel %vm1107_vm15, %v2801_v19, 256 }
 0x1b0   : > { %v1298_v17 = vsel %vm1297_vm1, %v1294_v34, %v1167_v36  ;;  %vm1299_vm2 = vcmp.lt.s32.totalorder %v1296_v4, %v1169_v52  ;;  %vm1115_vm10 = vcmp.eq.f32.partialorder %v3626_v31, %v2860_v56  ;;  %v1173_v0 = vsel %vm1109_vm0, %v3591_v5, 256 }
 0x1b1   : > { %v1300_v25 = vsel %vm1299_vm2, %v1296_v4, %v1169_v52  ;;  %vm1301_vm7 = vcmp.lt.s32.totalorder %v1298_v17, %v1171_v14  ;;  %vm1117_vm14 = vcmp.eq.f32.partialorder %v3627_v42, %v2860_v56  ;;  %v1175_v45 = vsel %vm1111_vm5, %v3594_v48, 256 }
 0x1b2   : > { %v1302_v29 = vsel %vm1301_vm7, %v1298_v17, %v1171_v14  ;;  %vm1303_vm3 = vcmp.lt.s32.totalorder %v1300_v25, %v1173_v0  ;;  %v1177_v11 = vsel %vm1113_vm12, %v3595_v2, 256  ;;  %v1179_v37 = vsel %vm1115_vm10, %v3596_v23, 256 }
 0x1b3   : > { %v1304_v49 = vsel %vm1303_vm3, %v1300_v25, %v1173_v0  ;;  %vm1305_vm4 = vcmp.lt.s32.totalorder %v1302_v29, %v1175_v45  ;;  %v1181_v40 = vsel %vm1117_vm14, %v2832_v26, 256  ;;  %v2183_v63 = vmov 1966171168  }
 0x1b4   : > { %v1306_v59 = vsel %vm1305_vm4, %v1302_v29, %v1175_v45  ;;  %vm1307_vm15 = vcmp.lt.s32.totalorder %v1304_v49, %v1177_v11  ;;  %v1326_v58 = vunpack.c.l.s4 %v2183_v63  ;;  %v2184_v61 = vmov 1.0  }
 0x1b5   : > { %v1308_v24 = vsel %vm1307_vm15, %v1304_v49, %v1177_v11  ;;  %vm1309_vm11 = vcmp.lt.s32.totalorder %v1306_v59, %v1179_v37  ;;  %vm1374_vm2 = vcmp.eq.s32.totalorder %v2768_v55, %v3053_v43  ;;  %vm1372_vm14 = vcmp.eq.s32.totalorder %v2765_v41, %v3053_v43 }
 0x1b6   : > { %v1310_v60 = vsel %vm1309_vm11, %v1306_v59, %v1179_v37  ;;  %vm1311_vm0 = vcmp.lt.s32.totalorder %v1308_v24, %v1181_v40  ;;  %v1327_v36 = vunpack.c.0.s8 %v1326_v58  ;;  %vm1370_vm4 = vcmp.eq.s32.totalorder %v2762_v47, %v3053_v43 }
 0x1b7   : > { %v1312_v18 = vsel %vm1311_vm0, %v1308_v24, %v1181_v40  ;;  %vm1368_vm0 = vcmp.eq.s32.totalorder %v2759_v39, %v3053_v43 }
 0x1b8   : > { %vm1313_vm9 = vcmp.lt.s32.totalorder %v1310_v60, %v1312_v18 }
 0x1b9   : > { %v1314_v56 = vsel %vm1313_vm9, %v1310_v60, %v1312_v18 }
 0x1ba   : > { %v1315_v20 = vrot.slane %v1314_v56, 4 }
 0x1bc   : > { %vm1316_vm5 = vcmp.lt.s32.totalorder %v1314_v56, %v1315_v20 }
 0x1bd   : > { %v1317_v50 = vsel %vm1316_vm5, %v1314_v56, %v1315_v20  ;;  %vm1366_vm5 = vcmp.eq.s32.totalorder %v2756_v44, %v3053_v43 }
 0x1be   : > { %v1318_v62 = vrot.slane %v1317_v50, 2 }
 0x1c0   : > { %vm1319_vm8 = vcmp.lt.s32.totalorder %v1317_v50, %v1318_v62 }
 0x1c1   : > { %v1320_v57 = vsel %vm1319_vm8, %v1317_v50, %v1318_v62 }
 0x1c2   : > { %v1321_v32 = vrot.slane %v1320_v57, 1 }
 0x1c4   : > { %vm1322_vm1 = vcmp.lt.s32.totalorder %v1320_v57, %v1321_v32 }
 0x1c5   : > { %v3128_v1 = vsel %vm1322_vm1, %v1320_v57, %v1321_v32  ;;  %vm1364_vm1 = vcmp.eq.s32.totalorder %v2753_v46, %v3053_v43 }
 0x1c6   : > { %vm1375_vm12 = vcmp.eq.s32.totalorder %v2768_v55, %v3128_v1  ;;  %vm1373_vm10 = vcmp.eq.s32.totalorder %v2765_v41, %v3128_v1  ;;  %vm1355_vm7 = vcmp.eq.s32.totalorder %v2738_v13, %v3128_v1  ;;  %vm1371_vm3 = vcmp.eq.s32.totalorder %v2762_v47, %v3128_v1 }
 0x1c7   : > { %1952 = vmatprep.subr.msk.mxu1 %vm1375_vm12, %v2184_v61  ;;  %vm1397_vm15 = vcmp.eq.s32.totalorder %v2801_v19, %v3128_v1  ;;  %vm1369_vm11 = vcmp.eq.s32.totalorder %v2759_v39, %v3128_v1  ;;  %v3156_v55 = vsub.s32 %v1327_v36, %v2701_v35  ;;  %vm1367_vm9 = vcmp.eq.s32.totalorder %v2756_v44, %v3128_v1  ;;  %v363_v19 = vld [vmem:[%s3422_s2] sm:$0xff] }
 0x1c8   : > { %1953 = vmatpush1.msk.msra.mxu1 %vm1374_vm2, %v2184_v61  ;;  %v1324_v41 = vcombine.low %v3053_v43, %v3128_v1  ;;  %vm1365_vm8 = vcmp.eq.s32.totalorder %v2753_v46, %v3128_v1  ;;  %v3628_v39 = vlaneseq  ;;  %vm1363_vm2 = vcmp.eq.s32.totalorder %v3612_v12, %v3128_v1 }
 0x1c9   : > { %1954 = vmatprep.subr.msk.mxu1 %vm1373_vm10, %v2184_v61  ;;  %vm1362_vm10 = vcmp.eq.s32.totalorder %v3612_v12, %v3053_v43 }
 0x1ca   : > { %1955 = vmatpush1.msk.msra.mxu1 %vm1372_vm14, %v2184_v61  ;;  %v1331_v47 = vrot.slane %v1324_v41, %v3156_v55  ;;  %vm3181_vm12 = vcmp.lt.s32.totalorder %v3628_v39, 256  ;;  %vm1361_vm14 = vcmp.eq.s32.totalorder %v3610_v9, %v3128_v1 }
 0x1cb   : > { %1956 = vmatprep.subr.msk.mxu1 %vm1371_vm3, %v2184_v61  ;;  %vm1360_vm3 = vcmp.eq.s32.totalorder %v3610_v9, %v3053_v43 }
 0x1cc   : > { %1957 = vmatpush1.msk.msra.mxu1 %vm1370_vm4, %v2184_v61  ;;  %v1338_v44 = vrot.slane %v1331_v47, %v3156_v55  ;;  %vm1359_vm4 = vcmp.eq.s32.totalorder %v3607_v7, %v3128_v1 }
 0x1cd   : > { %1958 = vmatprep.subr.msk.mxu1 %vm1369_vm11, %v2184_v61  ;;  %vm1358_vm11 = vcmp.eq.s32.totalorder %v3607_v7, %v3053_v43 }
 0x1ce   : > { %1959 = vmatpush1.msk.msra.mxu1 %vm1368_vm0, %v2184_v61  ;;  %1343 = vst.msk [vmem:[%s285_s17] sm:$0x3] %vm3181_vm12, %v1338_v44  ;;  %vm1357_vm0 = vcmp.eq.s32.totalorder %v2741_v8, %v3128_v1 }
 0x1cf   : > { %1960 = vmatprep.subr.msk.mxu1 %vm1367_vm9, %v2184_v61  ;;  %vm1356_vm9 = vcmp.eq.s32.totalorder %v2741_v8, %v3053_v43 }
 0x1d0   : > { %1961 = vmatpush1.msk.msra.mxu1 %vm1366_vm5, %v2184_v61  ;;  %vm1353_vm5 = vcmp.eq.s32.totalorder %v3603_v53, %v3128_v1 }
 0x1d1   : > { %1962 = vmatprep.subr.msk.mxu1 %vm1365_vm8, %v2184_v61  ;;  %vm1352_vm8 = vcmp.eq.s32.totalorder %v3603_v53, %v3053_v43 }
 0x1d2   : > { %1963 = vmatpush1.msk.msra.mxu1 %vm1364_vm1, %v2184_v61  ;;  %vm1351_vm1 = vcmp.eq.s32.totalorder %v2732_v21, %v3128_v1 }
 0x1d3   : > { %1964 = vmatprep.subr.msk.mxu1 %vm1363_vm2, %v2184_v61  ;;  %vm1348_vm2 = vcmp.eq.s32.totalorder %v2729_v38, %v3053_v43 }
 0x1d4   : > { %1965 = vmatpush1.msk.msra.mxu1 %vm1362_vm10, %v2184_v61  ;;  %vm1347_vm10 = vcmp.eq.s32.totalorder %v2726_v27, %v3128_v1 }
 0x1d5   : > { %1966 = vmatprep.subr.msk.mxu1 %vm1361_vm14, %v2184_v61  ;;  %vm1346_vm14 = vcmp.eq.s32.totalorder %v2726_v27, %v3053_v43 }
 0x1d6   : > { %1967 = vmatpush1.msk.msra.mxu1 %vm1360_vm3, %v2184_v61  ;;  %vm1345_vm3 = vcmp.eq.s32.totalorder %v2701_v35, %v3128_v1 }
 0x1d7   : > { %1968 = vmatprep.subr.msk.mxu1 %vm1359_vm4, %v2184_v61  ;;  %vm1344_vm4 = vcmp.eq.s32.totalorder %v2701_v35, %v3053_v43 }
 0x1d8   : > { %1969 = vmatpush1.msk.msra.mxu1 %vm1358_vm11, %v2184_v61  ;;  %vm1407_vm11 = vcmp.eq.s32.totalorder %v2832_v26, %v3128_v1 }
 0x1d9   : > { %1970 = vmatprep.subr.msk.mxu1 %vm1357_vm0, %v2184_v61  ;;  %vm1406_vm0 = vcmp.eq.s32.totalorder %v2832_v26, %v3053_v43 }
 0x1da   : > { %1971 = vmatpush1.msk.msra.mxu1 %vm1356_vm9, %v2184_v61  ;;  %vm1405_vm9 = vcmp.eq.s32.totalorder %v3596_v23, %v3128_v1 }
 0x1db   : > { %1972 = vmatprep.subr.msk.mxu1 %vm1355_vm7, %v2184_v61  ;;  %vm1350_vm7 = vcmp.eq.s32.totalorder %v2732_v21, %v3053_v43 }
 0x1dc   : > { %1973 = vmatpush1.msk.msra.mxu1 %vm1354_vm6, %v2184_v61  ;;  %vm1349_vm6 = vcmp.eq.s32.totalorder %v2729_v38, %v3128_v1 }
 0x1dd   : > { %1974 = vmatprep.subr.msk.mxu1 %vm1353_vm5, %v2184_v61  ;;  %vm1404_vm5 = vcmp.eq.s32.totalorder %v3596_v23, %v3053_v43 }
 0x1de   : > { %1975 = vmatpush1.msk.msra.mxu1 %vm1352_vm8, %v2184_v61  ;;  %vm1403_vm8 = vcmp.eq.s32.totalorder %v3595_v2, %v3128_v1 }
 0x1df   : > { %1976 = vmatprep.subr.msk.mxu1 %vm1351_vm1, %v2184_v61  ;;  %vm1402_vm1 = vcmp.eq.s32.totalorder %v3595_v2, %v3053_v43 }
 0x1e0   : > { %1977 = vmatpush1.msk.msra.mxu1 %vm1350_vm7, %v2184_v61  ;;  %vm1401_vm7 = vcmp.eq.s32.totalorder %v3594_v48, %v3128_v1 }
 0x1e1   : > { %1978 = vmatprep.subr.msk.mxu1 %vm1349_vm6, %v2184_v61  ;;  %vm1400_vm6 = vcmp.eq.s32.totalorder %v3594_v48, %v3053_v43 }
 0x1e2   : > { %1979 = vmatpush1.msk.msra.mxu1 %vm1348_vm2, %v2184_v61  ;;  %vm1399_vm2 = vcmp.eq.s32.totalorder %v3591_v5, %v3128_v1 }
 0x1e3   : > { %1980 = vmatprep.subr.msk.mxu1 %vm1347_vm10, %v2184_v61  ;;  %vm1398_vm10 = vcmp.eq.s32.totalorder %v3591_v5, %v3053_v43 }
 0x1e4   : > { %1981 = vmatpush1.msk.msra.mxu1 %vm1346_vm14, %v2184_v61  ;;  %vm1395_vm14 = vcmp.eq.s32.totalorder %v2798_v10, %v3128_v1 }
 0x1e5   : > { %1982 = vmatprep.subr.msk.mxu1 %vm1345_vm3, %v2184_v61  ;;  %vm1394_vm3 = vcmp.eq.s32.totalorder %v2798_v10, %v3053_v43  ;;  %v366_v10 = vld [vmem:[%s3422_s2 + $0x18] sm:$0xff] }
 0x1e6   : > { %1983 = vmatpush1.msk.msra.mxu1 %vm1344_vm4, %v2184_v61  ;;  %vm1393_vm4 = vcmp.eq.s32.totalorder %v2795_v30, %v3128_v1 }
 0x1e7   : > { %1984 = vmatprep.subr.msk.mxu1 %vm1407_vm11, %v2184_v61  ;;  %vm1390_vm11 = vcmp.eq.s32.totalorder %v2792_v3, %v3053_v43 }
 0x1e8   : > { %1985 = vmatpush2.msk.msra.mxu1 %vm1406_vm0, %v2184_v61  ;;  %vm1389_vm0 = vcmp.eq.s32.totalorder %v2789_v28, %v3128_v1 }
 0x1e9   : > { %1986 = vmatprep.subr.msk.mxu1 %vm1405_vm9, %v2184_v61  ;;  %vm1388_vm9 = vcmp.eq.s32.totalorder %v2789_v28, %v3053_v43 }
 0x1ea   : > { %1987 = vmatpush2.msk.msra.mxu1 %vm1404_vm5, %v2184_v61  ;;  %vm1387_vm5 = vcmp.eq.s32.totalorder %v2786_v33, %v3128_v1 }
 0x1eb   : > { %1988 = vmatprep.subr.msk.mxu1 %vm1403_vm8, %v2184_v61  ;;  %vm1386_vm8 = vcmp.eq.s32.totalorder %v2786_v33, %v3053_v43 }
 0x1ec   : > { %1989 = vmatpush2.msk.msra.mxu1 %vm1402_vm1, %v2184_v61  ;;  %vm1385_vm1 = vcmp.eq.s32.totalorder %v2783_v6, %v3128_v1 }
 0x1ed   : > { %1990 = vmatprep.subr.msk.mxu1 %vm1401_vm7, %v2184_v61  ;;  %vm1384_vm7 = vcmp.eq.s32.totalorder %v2783_v6, %v3053_v43 }
 0x1ee   : > { %1991 = vmatpush2.msk.msra.mxu1 %vm1400_vm6, %v2184_v61  ;;  %vm1383_vm6 = vcmp.eq.s32.totalorder %v2780_v22, %v3128_v1 }
 0x1ef   : > { %1992 = vmatprep.subr.msk.mxu1 %vm1399_vm2, %v2184_v61  ;;  %vm1382_vm2 = vcmp.eq.s32.totalorder %v2780_v22, %v3053_v43 }
 0x1f0   : > { %1993 = vmatpush2.msk.msra.mxu1 %vm1398_vm10, %v2184_v61  ;;  %vm1381_vm10 = vcmp.eq.s32.totalorder %v2777_v15, %v3128_v1 }
 0x1f1   : > { %1994 = vmatprep.subr.msk.mxu1 %vm1397_vm15, %v2184_v61  ;;  %vm1392_vm15 = vcmp.eq.s32.totalorder %v2795_v30, %v3053_v43  ;;  %v365_v30 = vld [vmem:[%s3422_s2 + $0x10] sm:$0xff] }
 0x1f2   : > { %1995 = vmatpush2.msk.msra.mxu1 %vm1396_vm13, %v2184_v61  ;;  %vm1391_vm13 = vcmp.eq.s32.totalorder %v2792_v3, %v3128_v1 }
 0x1f3   : > { %1996 = vmatprep.subr.msk.mxu1 %vm1395_vm14, %v2184_v61  ;;  %vm1380_vm14 = vcmp.eq.s32.totalorder %v2777_v15, %v3053_v43 }
 0x1f4   : > { %1997 = vmatpush2.msk.msra.mxu1 %vm1394_vm3, %v2184_v61  ;;  %vm1379_vm3 = vcmp.eq.s32.totalorder %v2774_v16, %v3128_v1 }
 0x1f5   : > { %1998 = vmatprep.subr.msk.mxu1 %vm1393_vm4, %v2184_v61  ;;  %vm1378_vm4 = vcmp.eq.s32.totalorder %v2774_v16, %v3053_v43 }
 0x1f6   : > { %1999 = vmatpush2.msk.msra.mxu1 %vm1392_vm15, %v2184_v61  ;;  %vm1377_vm15 = vcmp.eq.s32.totalorder %v2771_v51, %v3128_v1 }
 0x1f7   : > { %2000 = vmatprep.subr.msk.mxu1 %vm1391_vm13, %v2184_v61  ;;  %vm1376_vm13 = vcmp.eq.s32.totalorder %v2771_v51, %v3053_v43 }
 0x1f8   : > { %2001 = vmatpush2.msk.msra.mxu1 %vm1390_vm11, %v2184_v61 }
 0x1f9   : > { %2002 = vmatprep.subr.msk.mxu1 %vm1389_vm0, %v2184_v61 }
 0x1fa   : > { %2003 = vmatpush2.msk.msra.mxu1 %vm1388_vm9, %v2184_v61 }
 0x1fb   : > { %2004 = vmatprep.subr.msk.mxu1 %vm1387_vm5, %v2184_v61 }
 0x1fc   : > { %2005 = vmatpush2.msk.msra.mxu1 %vm1386_vm8, %v2184_v61 }
 0x1fd   : > { %2006 = vmatprep.subr.msk.mxu1 %vm1385_vm1, %v2184_v61 }
 0x1fe   : > { %2007 = vmatpush2.msk.msra.mxu1 %vm1384_vm7, %v2184_v61 }
 0x1ff   : > { %2008 = vmatprep.subr.msk.mxu1 %vm1383_vm6, %v2184_v61 }
 0x200   : > { %2009 = vmatpush2.msk.msra.mxu1 %vm1382_vm2, %v2184_v61 }
 0x201   : > { %2010 = vmatprep.subr.msk.mxu1 %vm1381_vm10, %v2184_v61 }
 0x202   : > { %2011 = vmatpush2.msk.msra.mxu1 %vm1380_vm14, %v2184_v61 }
 0x203   : > { %2012 = vmatprep.subr.msk.mxu1 %vm1379_vm3, %v2184_v61 }
 0x204   : > { %2013 = vmatpush2.msk.msra.mxu1 %vm1378_vm4, %v2184_v61 }
 0x205   : > { %2014 = vmatprep.subr.msk.mxu1 %vm1377_vm15, %v2184_v61 }
 0x206   : > { %2015 = vmatpush2.msk.msra.mxu1 %vm1376_vm13, %v2184_v61 }
 0x207   : > { %1601 = vmatmul.mubr.f32.vlgmr.msra.gmra.mxu1 %v363_v19 }
 0x208   : > { %1606 = vmatprep.mubr.f32.mxu1 %v366_v10 }
 0x20b   : > { %1607 = vmatmul.mubr.f32.gmra.mxu1 %v365_v30 }
 0x20c   : > { %2117 = shalt.err (!%p2114_p5)
}
 0x20d   : > { %s2118_s24 = scalar_lea.hbm %s1694_s19, 32  ;;  %s2122_s17 = scalar_lea.hbm %s3425_s5, 64 }
 0x20e   : > { %p2119_p6 = scmp.ne.s32.totalorder %s1694_s19, %s2118_s24  ;;  %p2123_p10 = scmp.lt.s32.totalorder %s1694_s19, %s3425_s5 }
 0x20f   : > { %p2124_p11 = scmp.lt.s32.totalorder %s2122_s17, %s2118_s24 }
 0x210   : > { %p2120_p7 = pnand %p2119_p6, %p2261_p4 }
 0x211   : > { %p2125_p12 = por %p2124_p11, %p2123_p10 }
 0x212   : > { %p2121_p9 = pneg %p2120_p7 }
 0x214   : > { %p2126_p13 = pnand %p2125_p12, %p2121_p9 }
 0x216   : > { %2129 = shalt.err (!%p2126_p13)
}
 0x217   : > { %2024 = dma.vmem_to_hbm [thread:$0]  (%p2261_p4), %s1697_s12, 32, %s1694_s19, %s1668_s20   ;;  %v2100_v22 = vld [vmem:[%s2289_s15] sm:$0xff]  ;;  %v2101_v51 = vld [vmem:[%s2289_s15 + $0x8] sm:$0xff]  ;;  %v2102_v46 = vld [vmem:[%s2289_s15 + $0x10] sm:$0xff] }
 0x218   : > { %s3631_s0 = sshll.u32 %s2280_s11, 5  ;;  %v2103_v13 = vld [vmem:[%s2289_s15 + $0x18] sm:$0xff]  ;;  %s1855_s7 = sshll.u32 %s2280_s11, 1 }
 0x219   : > { %s314_s18 = scalar_lea.vmem %s3424_s4, %s3631_s0  ;;  %s324_s19 = scalar_lea.vmem %s3426_s6, %s1855_s7 }
 0x2c7   : > { %v1602_v33 = vpop.f32.mrf.mxu1 }
 0x2c8   : > { %1613 = vst [vmem:[%s314_s18] sm:$0xff] %v1602_v33  ;;  %v1617_v15 = vsub.f32 %v1602_v33, %v2100_v22 }
 0x2c9   : > { %v1604_v6 = vpop.f32.mrf.mxu1 }
 0x2ca   : > { %1614 = vst [vmem:[%s314_s18 + $0x8] sm:$0xff] %v1604_v6  ;;  %v1618_v26 = vsub.f32 %v1604_v6, %v2101_v51  ;;  %v1621_v38 = vmul.f32 %v1617_v15, %v1617_v15 }
 0x2cb   : > { %v1608_v16 = vpop.f32.mrf.mxu1 }
 0x2cc   : > { %1615 = vst [vmem:[%s314_s18 + $0x10] sm:$0xff] %v1608_v16  ;;  %v1619_v35 = vsub.f32 %v1608_v16, %v2102_v46  ;;  %v1622_v28 = vmul.f32 %v1618_v26, %v1618_v26 }
 0x2cd   : > { %v1610_v27 = vpop.f32.mrf.mxu1 }
 0x2ce   : > { %v1623_v21 = vmul.f32 %v1619_v35, %v1619_v35  ;;  %1616 = vst [vmem:[%s314_s18 + $0x18] sm:$0xff] %v1610_v27  ;;  %v1620_v8 = vsub.f32 %v1610_v27, %v2103_v13 }
 0x2d0   : > { %v1625_v3 = vadd.f32 %v1623_v21, %v1621_v38  ;;  %v1624_v5 = vmul.f32 %v1620_v8, %v1620_v8 }
 0x2d2   : > { %v1626_v48 = vrot.slane %v1625_v3, 4  ;;  %v1632_v2 = vadd.f32 %v1624_v5, %v1622_v28 }
 0x2d4   : > { %v1627_v23 = vadd.f32 %v1626_v48, %v1625_v3  ;;  %v1633_v53 = vrot.slane %v1632_v2, 4 }
 0x2d6   : > { %v1628_v7 = vrot.slane %v1627_v23, 2  ;;  %v1634_v9 = vadd.f32 %v1633_v53, %v1632_v2 }
 0x2d8   : > { %v1629_v12 = vadd.f32 %v1628_v7, %v1627_v23  ;;  %v1635_v43 = vrot.slane %v1634_v9, 2 }
 0x2da   : > { %v1630_v52 = vrot.slane %v1629_v12, 1  ;;  %v1636_v4 = vadd.f32 %v1635_v43, %v1634_v9 }
 0x2dc   : > { %v1637_v54 = vrot.slane %v1636_v4, 1  ;;  %v1631_v14 = vadd.f32 %v1630_v52, %v1629_v12 }
 0x2de   : > { %v1638_v17 = vadd.f32 %v1637_v54, %v1636_v4 }
 0x2e0   : > { %v1641_v31 = vcombine.low %v1631_v14, %v1638_v17 }
 0x2e2   : > { %v1648_v0 = vrot.slane %v1641_v31, %v3156_v55 }
 0x2e4   : > { %v1655_v25 = vrot.slane %v1648_v0, %v3156_v55 }
 0x2e6   : > { %1657 = vst.msk [vmem:[%s324_s19] sm:$0x3] %vm3181_vm12, %v1655_v25 }
 0x2e7 PF: > { %p2030_p4 = scmp.ge.s32.totalorder %s2180_s26, 2  ;;  %s1724_s20 = sand.u32 1, %s2160_s21  }
 0x2e8   : > { %s1725_s11 = scalar_lea.sflag [#allocation3], %s1724_s20 }
 0x2e9   : > { %p2027_p0 = pnand %p2030_p4, %p2268_p8 }
 0x2eb   : > { %p2028_p1 = pneg %p2027_p0 }
 0x2ed   : > { %2155 = dma.done.wait (%p2028_p1), %s1725_s11, 32  }
 0x2ee   : > { %2157 = vsyncadd (%p2028_p1), %s1725_s11, 4294967264  ;;  %s20_s26 = sadd.s32 1, %s2180_s26   ;;  %s3632_s21 = smov %s2164_s22 }
 0x2ef   : > { %p17_p2 = scmp.ge.s32.totalorder %s20_s26, 4   ;;  %s3633_s22 = smov %s2168_s23 }
 0x2f0   : > { %s3634_s23 = smov %s2274_s10  ;;  %s3635_s24 = smov %s2176_s25 }
 0x2f1   : > { %s3636_s25 = smov %s3638_s29  ;;  %19 = sbr.rel (!%p17_p2) target bundleno = 7 (0x7), region = 95 }
 0x2f6   :  { %1741 = vsyncpa [#allocation3], 1 }
 0x2f7   :  { %1743 = vsyncpa [#allocation3 + $0x1], 1 }

</bundles_post_ra>
